<compile_context>
chip_gen: v7x
topology: tpu7x:2x2x1
jax: 0.10.0
libtpu: 0.0.40
codegen_flags: <defaults>
</compile_context>

<pallas_src>
import functools

import jax
import jax.numpy as jnp
from jax import lax
from jax.experimental import pallas as pl
from jax.experimental.pallas import tpu as pltpu

DIM = 64
NUM_HEADS = 8
HEAD_DIM = DIM // NUM_HEADS
VOCAB = 100
VOCAB_PAD = 128          # lane-dense vocab projection; sliced back to VOCAB in JAX
MAX_LEN = 100
FF_DIM = 4 * DIM
LN_EPS = 1e-5
NEG_BIG = -1e30          # large finite negative (robust even for fully-masked rows)


def _layernorm(x, g, b):
    mean = jnp.mean(x, axis=-1, keepdims=True)
    var = jnp.mean(jnp.square(x - mean), axis=-1, keepdims=True)
    return (x - mean) * lax.rsqrt(var + LN_EPS) * g + b


def _next_token_kernel(num_heads,
                       xe_ref,
                       wqkv_ref, bqkv_ref,
                       wo_ref, bo_ref, ln1g_ref, ln1b_ref,
                       w1_ref, b1_ref, w2_ref, b2_ref,
                       ln2g_ref, ln2b_ref,
                       wp_ref, bp_ref,
                       out_ref):
    bt, s_len, d = xe_ref.shape
    rows = bt * s_len
    d_head = d // num_heads

    # Dense (Bt*S, D) activation slab for every row-parallel matmul.
    x = xe_ref[...].reshape(rows, d)                       # (R, D) f32
    x_bf = x.astype(jnp.bfloat16)

    # Fused QKV projection: one bf16 matmul, f32 MXU accumulation.
    # (1/sqrt(d_head) is already folded into the Wq / bq columns by the wrapper.)
    qkv = jnp.dot(x_bf, wqkv_ref[...],
                  preferred_element_type=jnp.float32) + bqkv_ref[...]
    q3 = qkv[:, :d].reshape(bt, s_len, d)                  # f32, pre-scaled
    k3 = qkv[:, d:2 * d].reshape(bt, s_len, d)
    v3 = qkv[:, 2 * d:].reshape(bt, s_len, d)

    # Causal additive mask: built once per grid step, added per head (no
    # broadcast_to over the batch dim -> no bt materialized copies).
    row_i = lax.broadcasted_iota(jnp.int32, (s_len, s_len), 0)
    col_i = lax.broadcasted_iota(jnp.int32, (s_len, s_len), 1)
    mask2d = jnp.where(row_i >= col_i, 0.0, NEG_BIG).astype(jnp.float32)

    # Per-head attention (bf16 operands, f32 accumulation, approx reciprocal on
    # the EUP). Head outputs are tiny (bt, S, d_head) f32 pieces; they are
    # concatenated back to a dense (R, D) slab so the output projection is a
    # single K=64 bf16 matmul instead of 8 K=8 matmuls.
    o_heads = []
    for h in range(num_heads):
        lo, hi = h * d_head, (h + 1) * d_head
        qh = q3[:, :, lo:hi].astype(jnp.bfloat16)
        kh = k3[:, :, lo:hi].astype(jnp.bfloat16)
        vh = v3[:, :, lo:hi].astype(jnp.bfloat16)
        scores = jnp.einsum('bqd,bkd->bqk', qh, kh,
                            preferred_element_type=jnp.float32)
        scores = scores + mask2d[None, :, :]
        scores = scores - jnp.max(scores, axis=-1, keepdims=True)
        p = jnp.exp(scores)
        p = p * pl.reciprocal(jnp.sum(p, axis=-1, keepdims=True), approx=True)
        o_heads.append(
            jnp.einsum('bqk,bkd->bqd', p.astype(jnp.bfloat16), vh,
                       preferred_element_type=jnp.float32))
    o = jnp.concatenate(o_heads, axis=-1).reshape(rows, d)  # (R, D) f32

    # Single output projection (bf16 x bf16 -> f32).
    attn = jnp.dot(o.astype(jnp.bfloat16), wo_ref[...],
                   preferred_element_type=jnp.float32) + bo_ref[...]

    # Residual + LayerNorm 1 (f32).
    h1 = _layernorm(x + attn, ln1g_ref[...], ln1b_ref[...])

    # Feed-forward (ReLU), bf16 matmuls with f32 accumulation.
    f = jnp.dot(h1.astype(jnp.bfloat16), w1_ref[...],
                preferred_element_type=jnp.float32) + b1_ref[...]
    f = jnp.maximum(f, 0.0)
    f = jnp.dot(f.astype(jnp.bfloat16), w2_ref[...],
                preferred_element_type=jnp.float32) + b2_ref[...]

    # Residual + LayerNorm 2 (f32).
    h2 = _layernorm(h1 + f, ln2g_ref[...], ln2b_ref[...])

    # Vocab projection, lane-padded to 128 -> unmasked lane-dense output store.
    vp = wp_ref.shape[1]
    logits = jnp.dot(h2.astype(jnp.bfloat16), wp_ref[...],
                     preferred_element_type=jnp.float32) + bp_ref[...]
    out_ref[...] = logits.reshape(bt, s_len, vp)


def next_token_forward(token_ids, params):
    B, S = token_ids.shape
    D, V, VP = DIM, VOCAB, VOCAB_PAD

    # Glue: embedding gather + learned positional encoding (plain JAX).
    emb = (params["embed"][token_ids]
           + params["pos"][:S][None, :, :]).astype(jnp.float32)

    # Batch-block toward ~512 rows per grid step (amortizes ~0.35us/step grid
    # overhead, feeds the MXU full M passes per weight push), but keep at least
    # two batch-blocks whenever B >= 2 so the "parallel" axis can shard across
    # both TensorCores on v7x. VMEM footprint is tiny (<2 MiB) either way.
    rows_target = 512
    bt = max(1, min(B, rows_target // max(S, 1)))
    if B >= 2:
        bt = min(bt, -(-B // 2))
    b_pad = -(-B // bt) * bt
    if b_pad != B:
        emb = jnp.pad(emb, ((0, b_pad - B), (0, 0), (0, 0)))

    bf = jnp.bfloat16
    scale = 1.0 / (HEAD_DIM ** 0.5)

    # Fuse QKV weights/biases; fold the attention scale into the Q columns.
    wqkv = jnp.concatenate(
        [params["wq"] * scale, params["wk"], params["wv"]], axis=1).astype(bf)
    bqkv = jnp.concatenate(
        [params["bq"] * scale, params["bk"], params["bv"]],
        axis=1).astype(jnp.float32)

    # Lane-pad vocab projection to 128.
    wp = jnp.pad(params["wp"], ((0, 0), (0, VP - V))).astype(bf)
    bp = jnp.pad(params["bp"], ((0, 0), (0, VP - V))).astype(jnp.float32)

    weight_args = [
        wqkv, bqkv,
        params["wo"].astype(bf), params["bo"],
        params["ln1_g"], params["ln1_b"],
        params["w1"].astype(bf), params["b1"],
        params["w2"].astype(bf), params["b2"],
        params["ln2_g"], params["ln2_b"],
        wp, bp,
    ]

    def full_spec(shape):
        return pl.BlockSpec(shape, lambda b, _n=len(shape): (0,) * _n)

    in_specs = ([pl.BlockSpec((bt, S, D), lambda b: (b, 0, 0))]
                + [full_spec(w.shape) for w in weight_args])
    out_specs = pl.BlockSpec((bt, S, VP), lambda b: (b, 0, 0))

    kernel = functools.partial(_next_token_kernel, NUM_HEADS)

    logits = pl.pallas_call(
        kernel,
        out_shape=jax.ShapeDtypeStruct((b_pad, S, VP), jnp.float32),
        grid=(b_pad // bt,),
        in_specs=in_specs,
        out_specs=out_specs,
        compiler_params=pltpu.CompilerParams(
            dimension_semantics=("parallel",)),
    )(emb, *weight_args)

    return logits[:B, :, :V]


def init_params(key):
    ks = jax.random.split(key, 12)

    def nrm(k, shape, scale=0.02):
        return (scale * jax.random.normal(k, shape)).astype(jnp.float32)

    return {
        "embed": nrm(ks[0], (VOCAB, DIM), 1.0),
        "pos": nrm(ks[1], (MAX_LEN, DIM)),
        # attention projections stored as (in, out) so the kernel does x @ W + b
        "wq": nrm(ks[2], (DIM, DIM)), "bq": jnp.zeros((1, DIM), jnp.float32),
        "wk": nrm(ks[3], (DIM, DIM)), "bk": jnp.zeros((1, DIM), jnp.float32),
        "wv": nrm(ks[4], (DIM, DIM)), "bv": jnp.zeros((1, DIM), jnp.float32),
        "wo": nrm(ks[5], (DIM, DIM)), "bo": jnp.zeros((1, DIM), jnp.float32),
        "ln1_g": jnp.ones((1, DIM), jnp.float32),
        "ln1_b": jnp.zeros((1, DIM), jnp.float32),
        "w1": nrm(ks[6], (DIM, FF_DIM)), "b1": nrm(ks[7], (1, FF_DIM)),
        "w2": nrm(ks[8], (FF_DIM, DIM)), "b2": nrm(ks[9], (1, DIM)),
        "ln2_g": jnp.ones((1, DIM), jnp.float32),
        "ln2_b": jnp.zeros((1, DIM), jnp.float32),
        "wp": nrm(ks[10], (DIM, VOCAB)), "bp": nrm(ks[11], (1, VOCAB)),
    }


if __name__ == "__main__":
    key = jax.random.PRNGKey(0)
    pkey, dkey = jax.random.split(key)

    params = init_params(pkey)

    B, S = 2, 8
    token_ids = jax.random.randint(dkey, (B, S), 0, VOCAB, dtype=jnp.int32)

    logits = next_token_forward(token_ids, params)
    logits = jax.block_until_ready(logits)

    assert logits.shape == (B, S, VOCAB), logits.shape
    assert logits.dtype == jnp.float32
    assert bool(jnp.all(jnp.isfinite(logits)))
    print("KERNEL_OK")
</pallas_src>

<mosaic_0001>
module attributes {stable_mosaic.version = 11 : i64} {
  func.func @_next_token_kernel(%arg0: i32, %arg1: memref<1x8x64xf32, #tpu.memory_space<vmem>>, %arg2: memref<64x192xbf16, #tpu.memory_space<vmem>>, %arg3: memref<1x192xf32, #tpu.memory_space<vmem>>, %arg4: memref<64x64xbf16, #tpu.memory_space<vmem>>, %arg5: memref<1x64xf32, #tpu.memory_space<vmem>>, %arg6: memref<1x64xf32, #tpu.memory_space<vmem>>, %arg7: memref<1x64xf32, #tpu.memory_space<vmem>>, %arg8: memref<64x256xbf16, #tpu.memory_space<vmem>>, %arg9: memref<1x256xf32, #tpu.memory_space<vmem>>, %arg10: memref<256x64xbf16, #tpu.memory_space<vmem>>, %arg11: memref<1x64xf32, #tpu.memory_space<vmem>>, %arg12: memref<1x64xf32, #tpu.memory_space<vmem>>, %arg13: memref<1x64xf32, #tpu.memory_space<vmem>>, %arg14: memref<64x128xbf16, #tpu.memory_space<vmem>>, %arg15: memref<1x128xf32, #tpu.memory_space<vmem>>, %arg16: memref<1x8x128xf32, #tpu.memory_space<vmem>>) attributes {dimension_semantics = [#tpu.dimension_semantics<parallel>], iteration_bounds = array<i64: 2>, scalar_prefetch = 0 : i64, scratch_operands = 0 : i64, tpu.core_type = #tpu.core_type<tc>, window_params = [{transform_indices = @transform_0, window_bounds = array<i64: 1, 8, 64>}, {pipeline_mode = #tpu.pipeline_mode<synchronous>, transform_indices = @transform_1, window_bounds = array<i64: 64, 192>}, {pipeline_mode = #tpu.pipeline_mode<synchronous>, transform_indices = @transform_2, window_bounds = array<i64: 1, 192>}, {pipeline_mode = #tpu.pipeline_mode<synchronous>, transform_indices = @transform_3, window_bounds = array<i64: 64, 64>}, {pipeline_mode = #tpu.pipeline_mode<synchronous>, transform_indices = @transform_4, window_bounds = array<i64: 1, 64>}, {pipeline_mode = #tpu.pipeline_mode<synchronous>, transform_indices = @transform_5, window_bounds = array<i64: 1, 64>}, {pipeline_mode = #tpu.pipeline_mode<synchronous>, transform_indices = @transform_6, window_bounds = array<i64: 1, 64>}, {pipeline_mode = #tpu.pipeline_mode<synchronous>, transform_indices = @transform_7, window_bounds = array<i64: 64, 256>}, {pipeline_mode = #tpu.pipeline_mode<synchronous>, transform_indices = @transform_8, window_bounds = array<i64: 1, 256>}, {pipeline_mode = #tpu.pipeline_mode<synchronous>, transform_indices = @transform_9, window_bounds = array<i64: 256, 64>}, {pipeline_mode = #tpu.pipeline_mode<synchronous>, transform_indices = @transform_10, window_bounds = array<i64: 1, 64>}, {pipeline_mode = #tpu.pipeline_mode<synchronous>, transform_indices = @transform_11, window_bounds = array<i64: 1, 64>}, {pipeline_mode = #tpu.pipeline_mode<synchronous>, transform_indices = @transform_12, window_bounds = array<i64: 1, 64>}, {pipeline_mode = #tpu.pipeline_mode<synchronous>, transform_indices = @transform_13, window_bounds = array<i64: 64, 128>}, {pipeline_mode = #tpu.pipeline_mode<synchronous>, transform_indices = @transform_14, window_bounds = array<i64: 1, 128>}, {transform_indices = @transform_15, window_bounds = array<i64: 1, 8, 128>}]} {
    %c0 = arith.constant 0 : index
    %c0_0 = arith.constant 0 : index
    %c0_1 = arith.constant 0 : index
    %0 = vector.load %arg1[%c0, %c0_0, %c0_1] : memref<1x8x64xf32, #tpu.memory_space<vmem>>, vector<1x8x64xf32>
    %1 = vector.shape_cast %0 : vector<1x8x64xf32> to vector<8x64xf32>
    %2 = arith.truncf %1 : vector<8x64xf32> to vector<8x64xbf16>
    %c0_2 = arith.constant 0 : index
    %c0_3 = arith.constant 0 : index
    %3 = vector.load %arg2[%c0_2, %c0_3] : memref<64x192xbf16, #tpu.memory_space<vmem>>, vector<64x192xbf16>
    %cst = arith.constant dense<0.000000e+00> : vector<8x192xf32>
    %4 = tpu.matmul %2, %3, %cst {dimension_numbers = #tpu.dot_dimension_numbers<[1], [0], [0], [1], [0, 0, 1, 1], [], []>} : vector<8x64xbf16>, vector<64x192xbf16>, vector<8x192xf32> -> vector<8x192xf32>
    %c0_4 = arith.constant 0 : index
    %c0_5 = arith.constant 0 : index
    %5 = vector.load %arg3[%c0_4, %c0_5] : memref<1x192xf32, #tpu.memory_space<vmem>>, vector<1x192xf32>
    %6 = vector.broadcast %5 : vector<1x192xf32> to vector<8x192xf32>
    %7 = arith.addf %4, %6 : vector<8x192xf32>
    %8 = vector.extract_strided_slice %7 {offsets = [0, 0], sizes = [8, 64], strides = [1, 1]} : vector<8x192xf32> to vector<8x64xf32>
    %9 = vector.shape_cast %8 : vector<8x64xf32> to vector<1x8x64xf32>
    %10 = vector.extract_strided_slice %7 {offsets = [0, 64], sizes = [8, 64], strides = [1, 1]} : vector<8x192xf32> to vector<8x64xf32>
    %11 = vector.shape_cast %10 : vector<8x64xf32> to vector<1x8x64xf32>
    %12 = vector.extract_strided_slice %7 {offsets = [0, 128], sizes = [8, 64], strides = [1, 1]} : vector<8x192xf32> to vector<8x64xf32>
    %13 = vector.shape_cast %12 : vector<8x64xf32> to vector<1x8x64xf32>
    %14 = tpu.iota {dimensions = array<i32: 0>} : vector<8x8xi32>
    %15 = tpu.iota {dimensions = array<i32: 1>} : vector<8x8xi32>
    %16 = arith.cmpi sge, %14, %15 : vector<8x8xi32>
    %cst_6 = arith.constant 0.000000e+00 : f32
    %cst_7 = arith.constant -1.000000e+30 : f32
    %17 = vector.broadcast %cst_6 : f32 to vector<8x8xf32>
    %18 = vector.broadcast %cst_7 : f32 to vector<8x8xf32>
    %19 = arith.select %16, %17, %18 : vector<8x8xi1>, vector<8x8xf32>
    %20 = vector.extract_strided_slice %9 {offsets = [0, 0, 0], sizes = [1, 8, 8], strides = [1, 1, 1]} : vector<1x8x64xf32> to vector<1x8x8xf32>
    %21 = arith.truncf %20 : vector<1x8x8xf32> to vector<1x8x8xbf16>
    %22 = vector.extract_strided_slice %11 {offsets = [0, 0, 0], sizes = [1, 8, 8], strides = [1, 1, 1]} : vector<1x8x64xf32> to vector<1x8x8xf32>
    %23 = arith.truncf %22 : vector<1x8x8xf32> to vector<1x8x8xbf16>
    %24 = vector.extract_strided_slice %13 {offsets = [0, 0, 0], sizes = [1, 8, 8], strides = [1, 1, 1]} : vector<1x8x64xf32> to vector<1x8x8xf32>
    %25 = arith.truncf %24 : vector<1x8x8xf32> to vector<1x8x8xbf16>
    "tpu.trace_start"() <{level = 10 : i32, message = "bqd,bkd->bqk"}> : () -> ()
    %cst_8 = arith.constant dense<0.000000e+00> : vector<1x8x8xf32>
    %26 = tpu.matmul %21, %23, %cst_8 {dimension_numbers = #tpu.dot_dimension_numbers<[2], [2], [1], [1], [0, 0, 0, 1, 1, 1], [0], [0]>} : vector<1x8x8xbf16>, vector<1x8x8xbf16>, vector<1x8x8xf32> -> vector<1x8x8xf32>
    "tpu.trace_stop"() : () -> ()
    %27 = vector.shape_cast %19 : vector<8x8xf32> to vector<1x8x8xf32>
    %28 = arith.addf %26, %27 : vector<1x8x8xf32>
    %cst_9 = arith.constant dense<0xFF800000> : vector<1x8xf32>
    %29 = vector.multi_reduction <maximumf>, %28, %cst_9 [2] : vector<1x8x8xf32> to vector<1x8xf32>
    %30 = vector.shape_cast %29 : vector<1x8xf32> to vector<1x8x1xf32>
    %31 = vector.broadcast %30 : vector<1x8x1xf32> to vector<1x8x8xf32>
    %32 = arith.subf %28, %31 : vector<1x8x8xf32>
    %33 = math.exp %32 : vector<1x8x8xf32>
    %cst_10 = arith.constant dense<0.000000e+00> : vector<1x8xf32>
    %34 = vector.multi_reduction <add>, %33, %cst_10 [2] : vector<1x8x8xf32> to vector<1x8xf32>
    %35 = vector.shape_cast %34 : vector<1x8xf32> to vector<1x8x1xf32>
    %36 = tpu.reciprocal %35 {approx = true} : vector<1x8x1xf32> -> vector<1x8x1xf32>
    %37 = vector.broadcast %36 : vector<1x8x1xf32> to vector<1x8x8xf32>
    %38 = arith.mulf %33, %37 : vector<1x8x8xf32>
    %39 = arith.truncf %38 : vector<1x8x8xf32> to vector<1x8x8xbf16>
    "tpu.trace_start"() <{level = 10 : i32, message = "bqk,bkd->bqd"}> : () -> ()
    %cst_11 = arith.constant dense<0.000000e+00> : vector<1x8x8xf32>
    %40 = tpu.matmul %39, %25, %cst_11 {dimension_numbers = #tpu.dot_dimension_numbers<[2], [1], [1], [2], [0, 0, 0, 1, 1, 2], [0], [0]>} : vector<1x8x8xbf16>, vector<1x8x8xbf16>, vector<1x8x8xf32> -> vector<1x8x8xf32>
    "tpu.trace_stop"() : () -> ()
    %41 = vector.extract_strided_slice %9 {offsets = [0, 0, 8], sizes = [1, 8, 8], strides = [1, 1, 1]} : vector<1x8x64xf32> to vector<1x8x8xf32>
    %42 = arith.truncf %41 : vector<1x8x8xf32> to vector<1x8x8xbf16>
    %43 = vector.extract_strided_slice %11 {offsets = [0, 0, 8], sizes = [1, 8, 8], strides = [1, 1, 1]} : vector<1x8x64xf32> to vector<1x8x8xf32>
    %44 = arith.truncf %43 : vector<1x8x8xf32> to vector<1x8x8xbf16>
    %45 = vector.extract_strided_slice %13 {offsets = [0, 0, 8], sizes = [1, 8, 8], strides = [1, 1, 1]} : vector<1x8x64xf32> to vector<1x8x8xf32>
    %46 = arith.truncf %45 : vector<1x8x8xf32> to vector<1x8x8xbf16>
    "tpu.trace_start"() <{level = 10 : i32, message = "bqd,bkd->bqk"}> : () -> ()
    %cst_12 = arith.constant dense<0.000000e+00> : vector<1x8x8xf32>
    %47 = tpu.matmul %42, %44, %cst_12 {dimension_numbers = #tpu.dot_dimension_numbers<[2], [2], [1], [1], [0, 0, 0, 1, 1, 1], [0], [0]>} : vector<1x8x8xbf16>, vector<1x8x8xbf16>, vector<1x8x8xf32> -> vector<1x8x8xf32>
    "tpu.trace_stop"() : () -> ()
    %48 = vector.shape_cast %19 : vector<8x8xf32> to vector<1x8x8xf32>
    %49 = arith.addf %47, %48 : vector<1x8x8xf32>
    %cst_13 = arith.constant dense<0xFF800000> : vector<1x8xf32>
    %50 = vector.multi_reduction <maximumf>, %49, %cst_13 [2] : vector<1x8x8xf32> to vector<1x8xf32>
    %51 = vector.shape_cast %50 : vector<1x8xf32> to vector<1x8x1xf32>
    %52 = vector.broadcast %51 : vector<1x8x1xf32> to vector<1x8x8xf32>
    %53 = arith.subf %49, %52 : vector<1x8x8xf32>
    %54 = math.exp %53 : vector<1x8x8xf32>
    %cst_14 = arith.constant dense<0.000000e+00> : vector<1x8xf32>
    %55 = vector.multi_reduction <add>, %54, %cst_14 [2] : vector<1x8x8xf32> to vector<1x8xf32>
    %56 = vector.shape_cast %55 : vector<1x8xf32> to vector<1x8x1xf32>
    %57 = tpu.reciprocal %56 {approx = true} : vector<1x8x1xf32> -> vector<1x8x1xf32>
    %58 = vector.broadcast %57 : vector<1x8x1xf32> to vector<1x8x8xf32>
    %59 = arith.mulf %54, %58 : vector<1x8x8xf32>
    %60 = arith.truncf %59 : vector<1x8x8xf32> to vector<1x8x8xbf16>
    "tpu.trace_start"() <{level = 10 : i32, message = "bqk,bkd->bqd"}> : () -> ()
    %cst_15 = arith.constant dense<0.000000e+00> : vector<1x8x8xf32>
    %61 = tpu.matmul %60, %46, %cst_15 {dimension_numbers = #tpu.dot_dimension_numbers<[2], [1], [1], [2], [0, 0, 0, 1, 1, 2], [0], [0]>} : vector<1x8x8xbf16>, vector<1x8x8xbf16>, vector<1x8x8xf32> -> vector<1x8x8xf32>
    "tpu.trace_stop"() : () -> ()
    %62 = vector.extract_strided_slice %9 {offsets = [0, 0, 16], sizes = [1, 8, 8], strides = [1, 1, 1]} : vector<1x8x64xf32> to vector<1x8x8xf32>
    %63 = arith.truncf %62 : vector<1x8x8xf32> to vector<1x8x8xbf16>
    %64 = vector.extract_strided_slice %11 {offsets = [0, 0, 16], sizes = [1, 8, 8], strides = [1, 1, 1]} : vector<1x8x64xf32> to vector<1x8x8xf32>
    %65 = arith.truncf %64 : vector<1x8x8xf32> to vector<1x8x8xbf16>
    %66 = vector.extract_strided_slice %13 {offsets = [0, 0, 16], sizes = [1, 8, 8], strides = [1, 1, 1]} : vector<1x8x64xf32> to vector<1x8x8xf32>
    %67 = arith.truncf %66 : vector<1x8x8xf32> to vector<1x8x8xbf16>
    "tpu.trace_start"() <{level = 10 : i32, message = "bqd,bkd->bqk"}> : () -> ()
    %cst_16 = arith.constant dense<0.000000e+00> : vector<1x8x8xf32>
    %68 = tpu.matmul %63, %65, %cst_16 {dimension_numbers = #tpu.dot_dimension_numbers<[2], [2], [1], [1], [0, 0, 0, 1, 1, 1], [0], [0]>} : vector<1x8x8xbf16>, vector<1x8x8xbf16>, vector<1x8x8xf32> -> vector<1x8x8xf32>
    "tpu.trace_stop"() : () -> ()
    %69 = vector.shape_cast %19 : vector<8x8xf32> to vector<1x8x8xf32>
    %70 = arith.addf %68, %69 : vector<1x8x8xf32>
    %cst_17 = arith.constant dense<0xFF800000> : vector<1x8xf32>
    %71 = vector.multi_reduction <maximumf>, %70, %cst_17 [2] : vector<1x8x8xf32> to vector<1x8xf32>
    %72 = vector.shape_cast %71 : vector<1x8xf32> to vector<1x8x1xf32>
    %73 = vector.broadcast %72 : vector<1x8x1xf32> to vector<1x8x8xf32>
    %74 = arith.subf %70, %73 : vector<1x8x8xf32>
    %75 = math.exp %74 : vector<1x8x8xf32>
    %cst_18 = arith.constant dense<0.000000e+00> : vector<1x8xf32>
    %76 = vector.multi_reduction <add>, %75, %cst_18 [2] : vector<1x8x8xf32> to vector<1x8xf32>
    %77 = vector.shape_cast %76 : vector<1x8xf32> to vector<1x8x1xf32>
    %78 = tpu.reciprocal %77 {approx = true} : vector<1x8x1xf32> -> vector<1x8x1xf32>
    %79 = vector.broadcast %78 : vector<1x8x1xf32> to vector<1x8x8xf32>
    %80 = arith.mulf %75, %79 : vector<1x8x8xf32>
    %81 = arith.truncf %80 : vector<1x8x8xf32> to vector<1x8x8xbf16>
    "tpu.trace_start"() <{level = 10 : i32, message = "bqk,bkd->bqd"}> : () -> ()
    %cst_19 = arith.constant dense<0.000000e+00> : vector<1x8x8xf32>
    %82 = tpu.matmul %81, %67, %cst_19 {dimension_numbers = #tpu.dot_dimension_numbers<[2], [1], [1], [2], [0, 0, 0, 1, 1, 2], [0], [0]>} : vector<1x8x8xbf16>, vector<1x8x8xbf16>, vector<1x8x8xf32> -> vector<1x8x8xf32>
    "tpu.trace_stop"() : () -> ()
    %83 = vector.extract_strided_slice %9 {offsets = [0, 0, 24], sizes = [1, 8, 8], strides = [1, 1, 1]} : vector<1x8x64xf32> to vector<1x8x8xf32>
    %84 = arith.truncf %83 : vector<1x8x8xf32> to vector<1x8x8xbf16>
    %85 = vector.extract_strided_slice %11 {offsets = [0, 0, 24], sizes = [1, 8, 8], strides = [1, 1, 1]} : vector<1x8x64xf32> to vector<1x8x8xf32>
    %86 = arith.truncf %85 : vector<1x8x8xf32> to vector<1x8x8xbf16>
    %87 = vector.extract_strided_slice %13 {offsets = [0, 0, 24], sizes = [1, 8, 8], strides = [1, 1, 1]} : vector<1x8x64xf32> to vector<1x8x8xf32>
    %88 = arith.truncf %87 : vector<1x8x8xf32> to vector<1x8x8xbf16>
    "tpu.trace_start"() <{level = 10 : i32, message = "bqd,bkd->bqk"}> : () -> ()
    %cst_20 = arith.constant dense<0.000000e+00> : vector<1x8x8xf32>
    %89 = tpu.matmul %84, %86, %cst_20 {dimension_numbers = #tpu.dot_dimension_numbers<[2], [2], [1], [1], [0, 0, 0, 1, 1, 1], [0], [0]>} : vector<1x8x8xbf16>, vector<1x8x8xbf16>, vector<1x8x8xf32> -> vector<1x8x8xf32>
    "tpu.trace_stop"() : () -> ()
    %90 = vector.shape_cast %19 : vector<8x8xf32> to vector<1x8x8xf32>
    %91 = arith.addf %89, %90 : vector<1x8x8xf32>
    %cst_21 = arith.constant dense<0xFF800000> : vector<1x8xf32>
    %92 = vector.multi_reduction <maximumf>, %91, %cst_21 [2] : vector<1x8x8xf32> to vector<1x8xf32>
    %93 = vector.shape_cast %92 : vector<1x8xf32> to vector<1x8x1xf32>
    %94 = vector.broadcast %93 : vector<1x8x1xf32> to vector<1x8x8xf32>
    %95 = arith.subf %91, %94 : vector<1x8x8xf32>
    %96 = math.exp %95 : vector<1x8x8xf32>
    %cst_22 = arith.constant dense<0.000000e+00> : vector<1x8xf32>
    %97 = vector.multi_reduction <add>, %96, %cst_22 [2] : vector<1x8x8xf32> to vector<1x8xf32>
    %98 = vector.shape_cast %97 : vector<1x8xf32> to vector<1x8x1xf32>
    %99 = tpu.reciprocal %98 {approx = true} : vector<1x8x1xf32> -> vector<1x8x1xf32>
    %100 = vector.broadcast %99 : vector<1x8x1xf32> to vector<1x8x8xf32>
    %101 = arith.mulf %96, %100 : vector<1x8x8xf32>
    %102 = arith.truncf %101 : vector<1x8x8xf32> to vector<1x8x8xbf16>
    "tpu.trace_start"() <{level = 10 : i32, message = "bqk,bkd->bqd"}> : () -> ()
    %cst_23 = arith.constant dense<0.000000e+00> : vector<1x8x8xf32>
    %103 = tpu.matmul %102, %88, %cst_23 {dimension_numbers = #tpu.dot_dimension_numbers<[2], [1], [1], [2], [0, 0, 0, 1, 1, 2], [0], [0]>} : vector<1x8x8xbf16>, vector<1x8x8xbf16>, vector<1x8x8xf32> -> vector<1x8x8xf32>
    "tpu.trace_stop"() : () -> ()
    %104 = vector.extract_strided_slice %9 {offsets = [0, 0, 32], sizes = [1, 8, 8], strides = [1, 1, 1]} : vector<1x8x64xf32> to vector<1x8x8xf32>
    %105 = arith.truncf %104 : vector<1x8x8xf32> to vector<1x8x8xbf16>
    %106 = vector.extract_strided_slice %11 {offsets = [0, 0, 32], sizes = [1, 8, 8], strides = [1, 1, 1]} : vector<1x8x64xf32> to vector<1x8x8xf32>
    %107 = arith.truncf %106 : vector<1x8x8xf32> to vector<1x8x8xbf16>
    %108 = vector.extract_strided_slice %13 {offsets = [0, 0, 32], sizes = [1, 8, 8], strides = [1, 1, 1]} : vector<1x8x64xf32> to vector<1x8x8xf32>
    %109 = arith.truncf %108 : vector<1x8x8xf32> to vector<1x8x8xbf16>
    "tpu.trace_start"() <{level = 10 : i32, message = "bqd,bkd->bqk"}> : () -> ()
    %cst_24 = arith.constant dense<0.000000e+00> : vector<1x8x8xf32>
    %110 = tpu.matmul %105, %107, %cst_24 {dimension_numbers = #tpu.dot_dimension_numbers<[2], [2], [1], [1], [0, 0, 0, 1, 1, 1], [0], [0]>} : vector<1x8x8xbf16>, vector<1x8x8xbf16>, vector<1x8x8xf32> -> vector<1x8x8xf32>
    "tpu.trace_stop"() : () -> ()
    %111 = vector.shape_cast %19 : vector<8x8xf32> to vector<1x8x8xf32>
    %112 = arith.addf %110, %111 : vector<1x8x8xf32>
    %cst_25 = arith.constant dense<0xFF800000> : vector<1x8xf32>
    %113 = vector.multi_reduction <maximumf>, %112, %cst_25 [2] : vector<1x8x8xf32> to vector<1x8xf32>
    %114 = vector.shape_cast %113 : vector<1x8xf32> to vector<1x8x1xf32>
    %115 = vector.broadcast %114 : vector<1x8x1xf32> to vector<1x8x8xf32>
    %116 = arith.subf %112, %115 : vector<1x8x8xf32>
    %117 = math.exp %116 : vector<1x8x8xf32>
    %cst_26 = arith.constant dense<0.000000e+00> : vector<1x8xf32>
    %118 = vector.multi_reduction <add>, %117, %cst_26 [2] : vector<1x8x8xf32> to vector<1x8xf32>
    %119 = vector.shape_cast %118 : vector<1x8xf32> to vector<1x8x1xf32>
    %120 = tpu.reciprocal %119 {approx = true} : vector<1x8x1xf32> -> vector<1x8x1xf32>
    %121 = vector.broadcast %120 : vector<1x8x1xf32> to vector<1x8x8xf32>
    %122 = arith.mulf %117, %121 : vector<1x8x8xf32>
    %123 = arith.truncf %122 : vector<1x8x8xf32> to vector<1x8x8xbf16>
    "tpu.trace_start"() <{level = 10 : i32, message = "bqk,bkd->bqd"}> : () -> ()
    %cst_27 = arith.constant dense<0.000000e+00> : vector<1x8x8xf32>
    %124 = tpu.matmul %123, %109, %cst_27 {dimension_numbers = #tpu.dot_dimension_numbers<[2], [1], [1], [2], [0, 0, 0, 1, 1, 2], [0], [0]>} : vector<1x8x8xbf16>, vector<1x8x8xbf16>, vector<1x8x8xf32> -> vector<1x8x8xf32>
    "tpu.trace_stop"() : () -> ()
    %125 = vector.extract_strided_slice %9 {offsets = [0, 0, 40], sizes = [1, 8, 8], strides = [1, 1, 1]} : vector<1x8x64xf32> to vector<1x8x8xf32>
    %126 = arith.truncf %125 : vector<1x8x8xf32> to vector<1x8x8xbf16>
    %127 = vector.extract_strided_slice %11 {offsets = [0, 0, 40], sizes = [1, 8, 8], strides = [1, 1, 1]} : vector<1x8x64xf32> to vector<1x8x8xf32>
    %128 = arith.truncf %127 : vector<1x8x8xf32> to vector<1x8x8xbf16>
    %129 = vector.extract_strided_slice %13 {offsets = [0, 0, 40], sizes = [1, 8, 8], strides = [1, 1, 1]} : vector<1x8x64xf32> to vector<1x8x8xf32>
    %130 = arith.truncf %129 : vector<1x8x8xf32> to vector<1x8x8xbf16>
    "tpu.trace_start"() <{level = 10 : i32, message = "bqd,bkd->bqk"}> : () -> ()
    %cst_28 = arith.constant dense<0.000000e+00> : vector<1x8x8xf32>
    %131 = tpu.matmul %126, %128, %cst_28 {dimension_numbers = #tpu.dot_dimension_numbers<[2], [2], [1], [1], [0, 0, 0, 1, 1, 1], [0], [0]>} : vector<1x8x8xbf16>, vector<1x8x8xbf16>, vector<1x8x8xf32> -> vector<1x8x8xf32>
    "tpu.trace_stop"() : () -> ()
    %132 = vector.shape_cast %19 : vector<8x8xf32> to vector<1x8x8xf32>
    %133 = arith.addf %131, %132 : vector<1x8x8xf32>
    %cst_29 = arith.constant dense<0xFF800000> : vector<1x8xf32>
    %134 = vector.multi_reduction <maximumf>, %133, %cst_29 [2] : vector<1x8x8xf32> to vector<1x8xf32>
    %135 = vector.shape_cast %134 : vector<1x8xf32> to vector<1x8x1xf32>
    %136 = vector.broadcast %135 : vector<1x8x1xf32> to vector<1x8x8xf32>
    %137 = arith.subf %133, %136 : vector<1x8x8xf32>
    %138 = math.exp %137 : vector<1x8x8xf32>
    %cst_30 = arith.constant dense<0.000000e+00> : vector<1x8xf32>
    %139 = vector.multi_reduction <add>, %138, %cst_30 [2] : vector<1x8x8xf32> to vector<1x8xf32>
    %140 = vector.shape_cast %139 : vector<1x8xf32> to vector<1x8x1xf32>
    %141 = tpu.reciprocal %140 {approx = true} : vector<1x8x1xf32> -> vector<1x8x1xf32>
    %142 = vector.broadcast %141 : vector<1x8x1xf32> to vector<1x8x8xf32>
    %143 = arith.mulf %138, %142 : vector<1x8x8xf32>
    %144 = arith.truncf %143 : vector<1x8x8xf32> to vector<1x8x8xbf16>
    "tpu.trace_start"() <{level = 10 : i32, message = "bqk,bkd->bqd"}> : () -> ()
    %cst_31 = arith.constant dense<0.000000e+00> : vector<1x8x8xf32>
    %145 = tpu.matmul %144, %130, %cst_31 {dimension_numbers = #tpu.dot_dimension_numbers<[2], [1], [1], [2], [0, 0, 0, 1, 1, 2], [0], [0]>} : vector<1x8x8xbf16>, vector<1x8x8xbf16>, vector<1x8x8xf32> -> vector<1x8x8xf32>
    "tpu.trace_stop"() : () -> ()
    %146 = vector.extract_strided_slice %9 {offsets = [0, 0, 48], sizes = [1, 8, 8], strides = [1, 1, 1]} : vector<1x8x64xf32> to vector<1x8x8xf32>
    %147 = arith.truncf %146 : vector<1x8x8xf32> to vector<1x8x8xbf16>
    %148 = vector.extract_strided_slice %11 {offsets = [0, 0, 48], sizes = [1, 8, 8], strides = [1, 1, 1]} : vector<1x8x64xf32> to vector<1x8x8xf32>
    %149 = arith.truncf %148 : vector<1x8x8xf32> to vector<1x8x8xbf16>
    %150 = vector.extract_strided_slice %13 {offsets = [0, 0, 48], sizes = [1, 8, 8], strides = [1, 1, 1]} : vector<1x8x64xf32> to vector<1x8x8xf32>
    %151 = arith.truncf %150 : vector<1x8x8xf32> to vector<1x8x8xbf16>
    "tpu.trace_start"() <{level = 10 : i32, message = "bqd,bkd->bqk"}> : () -> ()
    %cst_32 = arith.constant dense<0.000000e+00> : vector<1x8x8xf32>
    %152 = tpu.matmul %147, %149, %cst_32 {dimension_numbers = #tpu.dot_dimension_numbers<[2], [2], [1], [1], [0, 0, 0, 1, 1, 1], [0], [0]>} : vector<1x8x8xbf16>, vector<1x8x8xbf16>, vector<1x8x8xf32> -> vector<1x8x8xf32>
    "tpu.trace_stop"() : () -> ()
    %153 = vector.shape_cast %19 : vector<8x8xf32> to vector<1x8x8xf32>
    %154 = arith.addf %152, %153 : vector<1x8x8xf32>
    %cst_33 = arith.constant dense<0xFF800000> : vector<1x8xf32>
    %155 = vector.multi_reduction <maximumf>, %154, %cst_33 [2] : vector<1x8x8xf32> to vector<1x8xf32>
    %156 = vector.shape_cast %155 : vector<1x8xf32> to vector<1x8x1xf32>
    %157 = vector.broadcast %156 : vector<1x8x1xf32> to vector<1x8x8xf32>
    %158 = arith.subf %154, %157 : vector<1x8x8xf32>
    %159 = math.exp %158 : vector<1x8x8xf32>
    %cst_34 = arith.constant dense<0.000000e+00> : vector<1x8xf32>
    %160 = vector.multi_reduction <add>, %159, %cst_34 [2] : vector<1x8x8xf32> to vector<1x8xf32>
    %161 = vector.shape_cast %160 : vector<1x8xf32> to vector<1x8x1xf32>
    %162 = tpu.reciprocal %161 {approx = true} : vector<1x8x1xf32> -> vector<1x8x1xf32>
    %163 = vector.broadcast %162 : vector<1x8x1xf32> to vector<1x8x8xf32>
    %164 = arith.mulf %159, %163 : vector<1x8x8xf32>
    %165 = arith.truncf %164 : vector<1x8x8xf32> to vector<1x8x8xbf16>
    "tpu.trace_start"() <{level = 10 : i32, message = "bqk,bkd->bqd"}> : () -> ()
    %cst_35 = arith.constant dense<0.000000e+00> : vector<1x8x8xf32>
    %166 = tpu.matmul %165, %151, %cst_35 {dimension_numbers = #tpu.dot_dimension_numbers<[2], [1], [1], [2], [0, 0, 0, 1, 1, 2], [0], [0]>} : vector<1x8x8xbf16>, vector<1x8x8xbf16>, vector<1x8x8xf32> -> vector<1x8x8xf32>
    "tpu.trace_stop"() : () -> ()
    %167 = vector.extract_strided_slice %9 {offsets = [0, 0, 56], sizes = [1, 8, 8], strides = [1, 1, 1]} : vector<1x8x64xf32> to vector<1x8x8xf32>
    %168 = arith.truncf %167 : vector<1x8x8xf32> to vector<1x8x8xbf16>
    %169 = vector.extract_strided_slice %11 {offsets = [0, 0, 56], sizes = [1, 8, 8], strides = [1, 1, 1]} : vector<1x8x64xf32> to vector<1x8x8xf32>
    %170 = arith.truncf %169 : vector<1x8x8xf32> to vector<1x8x8xbf16>
    %171 = vector.extract_strided_slice %13 {offsets = [0, 0, 56], sizes = [1, 8, 8], strides = [1, 1, 1]} : vector<1x8x64xf32> to vector<1x8x8xf32>
    %172 = arith.truncf %171 : vector<1x8x8xf32> to vector<1x8x8xbf16>
    "tpu.trace_start"() <{level = 10 : i32, message = "bqd,bkd->bqk"}> : () -> ()
    %cst_36 = arith.constant dense<0.000000e+00> : vector<1x8x8xf32>
    %173 = tpu.matmul %168, %170, %cst_36 {dimension_numbers = #tpu.dot_dimension_numbers<[2], [2], [1], [1], [0, 0, 0, 1, 1, 1], [0], [0]>} : vector<1x8x8xbf16>, vector<1x8x8xbf16>, vector<1x8x8xf32> -> vector<1x8x8xf32>
    "tpu.trace_stop"() : () -> ()
    %174 = vector.shape_cast %19 : vector<8x8xf32> to vector<1x8x8xf32>
    %175 = arith.addf %173, %174 : vector<1x8x8xf32>
    %cst_37 = arith.constant dense<0xFF800000> : vector<1x8xf32>
    %176 = vector.multi_reduction <maximumf>, %175, %cst_37 [2] : vector<1x8x8xf32> to vector<1x8xf32>
    %177 = vector.shape_cast %176 : vector<1x8xf32> to vector<1x8x1xf32>
    %178 = vector.broadcast %177 : vector<1x8x1xf32> to vector<1x8x8xf32>
    %179 = arith.subf %175, %178 : vector<1x8x8xf32>
    %180 = math.exp %179 : vector<1x8x8xf32>
    %cst_38 = arith.constant dense<0.000000e+00> : vector<1x8xf32>
    %181 = vector.multi_reduction <add>, %180, %cst_38 [2] : vector<1x8x8xf32> to vector<1x8xf32>
    %182 = vector.shape_cast %181 : vector<1x8xf32> to vector<1x8x1xf32>
    %183 = tpu.reciprocal %182 {approx = true} : vector<1x8x1xf32> -> vector<1x8x1xf32>
    %184 = vector.broadcast %183 : vector<1x8x1xf32> to vector<1x8x8xf32>
    %185 = arith.mulf %180, %184 : vector<1x8x8xf32>
    %186 = arith.truncf %185 : vector<1x8x8xf32> to vector<1x8x8xbf16>
    "tpu.trace_start"() <{level = 10 : i32, message = "bqk,bkd->bqd"}> : () -> ()
    %cst_39 = arith.constant dense<0.000000e+00> : vector<1x8x8xf32>
    %187 = tpu.matmul %186, %172, %cst_39 {dimension_numbers = #tpu.dot_dimension_numbers<[2], [1], [1], [2], [0, 0, 0, 1, 1, 2], [0], [0]>} : vector<1x8x8xbf16>, vector<1x8x8xbf16>, vector<1x8x8xf32> -> vector<1x8x8xf32>
    "tpu.trace_stop"() : () -> ()
    %188 = tpu.concatenate %40, %61, %82, %103, %124, %145, %166, %187 in 2 : vector<1x8x8xf32>, vector<1x8x8xf32>, vector<1x8x8xf32>, vector<1x8x8xf32>, vector<1x8x8xf32>, vector<1x8x8xf32>, vector<1x8x8xf32>, vector<1x8x8xf32> -> vector<1x8x64xf32>
    %189 = vector.shape_cast %188 : vector<1x8x64xf32> to vector<8x64xf32>
    %190 = arith.truncf %189 : vector<8x64xf32> to vector<8x64xbf16>
    %c0_40 = arith.constant 0 : index
    %c0_41 = arith.constant 0 : index
    %191 = vector.load %arg4[%c0_40, %c0_41] : memref<64x64xbf16, #tpu.memory_space<vmem>>, vector<64x64xbf16>
    %cst_42 = arith.constant dense<0.000000e+00> : vector<8x64xf32>
    %192 = tpu.matmul %190, %191, %cst_42 {dimension_numbers = #tpu.dot_dimension_numbers<[1], [0], [0], [1], [0, 0, 1, 1], [], []>} : vector<8x64xbf16>, vector<64x64xbf16>, vector<8x64xf32> -> vector<8x64xf32>
    %c0_43 = arith.constant 0 : index
    %c0_44 = arith.constant 0 : index
    %193 = vector.load %arg5[%c0_43, %c0_44] : memref<1x64xf32, #tpu.memory_space<vmem>>, vector<1x64xf32>
    %194 = vector.broadcast %193 : vector<1x64xf32> to vector<8x64xf32>
    %195 = arith.addf %192, %194 : vector<8x64xf32>
    %196 = arith.addf %1, %195 : vector<8x64xf32>
    %c0_45 = arith.constant 0 : index
    %c0_46 = arith.constant 0 : index
    %197 = vector.load %arg6[%c0_45, %c0_46] : memref<1x64xf32, #tpu.memory_space<vmem>>, vector<1x64xf32>
    %c0_47 = arith.constant 0 : index
    %c0_48 = arith.constant 0 : index
    %198 = vector.load %arg7[%c0_47, %c0_48] : memref<1x64xf32, #tpu.memory_space<vmem>>, vector<1x64xf32>
    %cst_49 = arith.constant dense<0.000000e+00> : vector<8xf32>
    %199 = vector.multi_reduction <add>, %196, %cst_49 [1] : vector<8x64xf32> to vector<8xf32>
    %200 = vector.shape_cast %199 : vector<8xf32> to vector<8x1xf32>
    %cst_50 = arith.constant 6.400000e+01 : f32
    %201 = vector.broadcast %cst_50 : f32 to vector<8x1xf32>
    %202 = arith.divf %200, %201 : vector<8x1xf32>
    %203 = vector.broadcast %202 : vector<8x1xf32> to vector<8x64xf32>
    %204 = arith.subf %196, %203 : vector<8x64xf32>
    %205 = arith.mulf %204, %204 : vector<8x64xf32>
    %cst_51 = arith.constant dense<0.000000e+00> : vector<8xf32>
    %206 = vector.multi_reduction <add>, %205, %cst_51 [1] : vector<8x64xf32> to vector<8xf32>
    %207 = vector.shape_cast %206 : vector<8xf32> to vector<8x1xf32>
    %cst_52 = arith.constant 6.400000e+01 : f32
    %208 = vector.broadcast %cst_52 : f32 to vector<8x1xf32>
    %209 = arith.divf %207, %208 : vector<8x1xf32>
    %210 = vector.broadcast %202 : vector<8x1xf32> to vector<8x64xf32>
    %211 = arith.subf %196, %210 : vector<8x64xf32>
    %cst_53 = arith.constant 9.99999974E-6 : f32
    %212 = vector.broadcast %cst_53 : f32 to vector<8x1xf32>
    %213 = arith.addf %209, %212 : vector<8x1xf32>
    %214 = math.rsqrt %213 : vector<8x1xf32>
    %215 = vector.broadcast %214 : vector<8x1xf32> to vector<8x64xf32>
    %216 = arith.mulf %211, %215 : vector<8x64xf32>
    %217 = vector.broadcast %197 : vector<1x64xf32> to vector<8x64xf32>
    %218 = arith.mulf %216, %217 : vector<8x64xf32>
    %219 = vector.broadcast %198 : vector<1x64xf32> to vector<8x64xf32>
    %220 = arith.addf %218, %219 : vector<8x64xf32>
    %221 = arith.truncf %220 : vector<8x64xf32> to vector<8x64xbf16>
    %c0_54 = arith.constant 0 : index
    %c0_55 = arith.constant 0 : index
    %222 = vector.load %arg8[%c0_54, %c0_55] : memref<64x256xbf16, #tpu.memory_space<vmem>>, vector<64x256xbf16>
    %cst_56 = arith.constant dense<0.000000e+00> : vector<8x256xf32>
    %223 = tpu.matmul %221, %222, %cst_56 {dimension_numbers = #tpu.dot_dimension_numbers<[1], [0], [0], [1], [0, 0, 1, 1], [], []>} : vector<8x64xbf16>, vector<64x256xbf16>, vector<8x256xf32> -> vector<8x256xf32>
    %c0_57 = arith.constant 0 : index
    %c0_58 = arith.constant 0 : index
    %224 = vector.load %arg9[%c0_57, %c0_58] : memref<1x256xf32, #tpu.memory_space<vmem>>, vector<1x256xf32>
    %225 = vector.broadcast %224 : vector<1x256xf32> to vector<8x256xf32>
    %226 = arith.addf %223, %225 : vector<8x256xf32>
    %cst_59 = arith.constant 0.000000e+00 : f32
    %227 = vector.broadcast %cst_59 : f32 to vector<8x256xf32>
    %228 = arith.maximumf %226, %227 : vector<8x256xf32>
    %229 = arith.truncf %228 : vector<8x256xf32> to vector<8x256xbf16>
    %c0_60 = arith.constant 0 : index
    %c0_61 = arith.constant 0 : index
    %230 = vector.load %arg10[%c0_60, %c0_61] : memref<256x64xbf16, #tpu.memory_space<vmem>>, vector<256x64xbf16>
    %cst_62 = arith.constant dense<0.000000e+00> : vector<8x64xf32>
    %231 = tpu.matmul %229, %230, %cst_62 {dimension_numbers = #tpu.dot_dimension_numbers<[1], [0], [0], [1], [0, 0, 1, 1], [], []>} : vector<8x256xbf16>, vector<256x64xbf16>, vector<8x64xf32> -> vector<8x64xf32>
    %c0_63 = arith.constant 0 : index
    %c0_64 = arith.constant 0 : index
    %232 = vector.load %arg11[%c0_63, %c0_64] : memref<1x64xf32, #tpu.memory_space<vmem>>, vector<1x64xf32>
    %233 = vector.broadcast %232 : vector<1x64xf32> to vector<8x64xf32>
    %234 = arith.addf %231, %233 : vector<8x64xf32>
    %235 = arith.addf %220, %234 : vector<8x64xf32>
    %c0_65 = arith.constant 0 : index
    %c0_66 = arith.constant 0 : index
    %236 = vector.load %arg12[%c0_65, %c0_66] : memref<1x64xf32, #tpu.memory_space<vmem>>, vector<1x64xf32>
    %c0_67 = arith.constant 0 : index
    %c0_68 = arith.constant 0 : index
    %237 = vector.load %arg13[%c0_67, %c0_68] : memref<1x64xf32, #tpu.memory_space<vmem>>, vector<1x64xf32>
    %cst_69 = arith.constant dense<0.000000e+00> : vector<8xf32>
    %238 = vector.multi_reduction <add>, %235, %cst_69 [1] : vector<8x64xf32> to vector<8xf32>
    %239 = vector.shape_cast %238 : vector<8xf32> to vector<8x1xf32>
    %cst_70 = arith.constant 6.400000e+01 : f32
    %240 = vector.broadcast %cst_70 : f32 to vector<8x1xf32>
    %241 = arith.divf %239, %240 : vector<8x1xf32>
    %242 = vector.broadcast %241 : vector<8x1xf32> to vector<8x64xf32>
    %243 = arith.subf %235, %242 : vector<8x64xf32>
    %244 = arith.mulf %243, %243 : vector<8x64xf32>
    %cst_71 = arith.constant dense<0.000000e+00> : vector<8xf32>
    %245 = vector.multi_reduction <add>, %244, %cst_71 [1] : vector<8x64xf32> to vector<8xf32>
    %246 = vector.shape_cast %245 : vector<8xf32> to vector<8x1xf32>
    %cst_72 = arith.constant 6.400000e+01 : f32
    %247 = vector.broadcast %cst_72 : f32 to vector<8x1xf32>
    %248 = arith.divf %246, %247 : vector<8x1xf32>
    %249 = vector.broadcast %241 : vector<8x1xf32> to vector<8x64xf32>
    %250 = arith.subf %235, %249 : vector<8x64xf32>
    %cst_73 = arith.constant 9.99999974E-6 : f32
    %251 = vector.broadcast %cst_73 : f32 to vector<8x1xf32>
    %252 = arith.addf %248, %251 : vector<8x1xf32>
    %253 = math.rsqrt %252 : vector<8x1xf32>
    %254 = vector.broadcast %253 : vector<8x1xf32> to vector<8x64xf32>
    %255 = arith.mulf %250, %254 : vector<8x64xf32>
    %256 = vector.broadcast %236 : vector<1x64xf32> to vector<8x64xf32>
    %257 = arith.mulf %255, %256 : vector<8x64xf32>
    %258 = vector.broadcast %237 : vector<1x64xf32> to vector<8x64xf32>
    %259 = arith.addf %257, %258 : vector<8x64xf32>
    %260 = arith.truncf %259 : vector<8x64xf32> to vector<8x64xbf16>
    %c0_74 = arith.constant 0 : index
    %c0_75 = arith.constant 0 : index
    %261 = vector.load %arg14[%c0_74, %c0_75] : memref<64x128xbf16, #tpu.memory_space<vmem>>, vector<64x128xbf16>
    %cst_76 = arith.constant dense<0.000000e+00> : vector<8x128xf32>
    %262 = tpu.matmul %260, %261, %cst_76 {dimension_numbers = #tpu.dot_dimension_numbers<[1], [0], [0], [1], [0, 0, 1, 1], [], []>} : vector<8x64xbf16>, vector<64x128xbf16>, vector<8x128xf32> -> vector<8x128xf32>
    %c0_77 = arith.constant 0 : index
    %c0_78 = arith.constant 0 : index
    %263 = vector.load %arg15[%c0_77, %c0_78] : memref<1x128xf32, #tpu.memory_space<vmem>>, vector<1x128xf32>
    %264 = vector.broadcast %263 : vector<1x128xf32> to vector<8x128xf32>
    %265 = arith.addf %262, %264 : vector<8x128xf32>
    %266 = vector.shape_cast %265 : vector<8x128xf32> to vector<1x8x128xf32>
    %c0_79 = arith.constant 0 : index
    %c0_80 = arith.constant 0 : index
    %c0_81 = arith.constant 0 : index
    %267 = vector.load %arg16[%c0_79, %c0_80, %c0_81] : memref<1x8x128xf32, #tpu.memory_space<vmem>>, vector<1x8x128xf32>
    tpu.vector_store %arg16[%c0_79, %c0_80, %c0_81], %266 {strides = array<i32>} : memref<1x8x128xf32, #tpu.memory_space<vmem>>, vector<1x8x128xf32>,
    return
  }
  func.func @transform_0(%arg0: i32) -> (i32, i32, i32) {
    %c0_i32 = arith.constant 0 : i32
    %c0_i32_0 = arith.constant 0 : i32
    %c0_i32_1 = arith.constant 0 : i32
    return %arg0, %c0_i32, %c0_i32_0 : i32, i32, i32
  }
  func.func @transform_1(%arg0: i32) -> (i32, i32) {
    %c0_i32 = arith.constant 0 : i32
    %c0_i32_0 = arith.constant 0 : i32
    %c0_i32_1 = arith.constant 0 : i32
    return %c0_i32, %c0_i32_0 : i32, i32
  }
  func.func @transform_2(%arg0: i32) -> (i32, i32) {
    %c0_i32 = arith.constant 0 : i32
    %c0_i32_0 = arith.constant 0 : i32
    %c0_i32_1 = arith.constant 0 : i32
    return %c0_i32, %c0_i32_0 : i32, i32
  }
  func.func @transform_3(%arg0: i32) -> (i32, i32) {
    %c0_i32 = arith.constant 0 : i32
    %c0_i32_0 = arith.constant 0 : i32
    %c0_i32_1 = arith.constant 0 : i32
    return %c0_i32, %c0_i32_0 : i32, i32
  }
  func.func @transform_4(%arg0: i32) -> (i32, i32) {
    %c0_i32 = arith.constant 0 : i32
    %c0_i32_0 = arith.constant 0 : i32
    %c0_i32_1 = arith.constant 0 : i32
    return %c0_i32, %c0_i32_0 : i32, i32
  }
  func.func @transform_5(%arg0: i32) -> (i32, i32) {
    %c0_i32 = arith.constant 0 : i32
    %c0_i32_0 = arith.constant 0 : i32
    %c0_i32_1 = arith.constant 0 : i32
    return %c0_i32, %c0_i32_0 : i32, i32
  }
  func.func @transform_6(%arg0: i32) -> (i32, i32) {
    %c0_i32 = arith.constant 0 : i32
    %c0_i32_0 = arith.constant 0 : i32
    %c0_i32_1 = arith.constant 0 : i32
    return %c0_i32, %c0_i32_0 : i32, i32
  }
  func.func @transform_7(%arg0: i32) -> (i32, i32) {
    %c0_i32 = arith.constant 0 : i32
    %c0_i32_0 = arith.constant 0 : i32
    %c0_i32_1 = arith.constant 0 : i32
    return %c0_i32, %c0_i32_0 : i32, i32
  }
  func.func @transform_8(%arg0: i32) -> (i32, i32) {
    %c0_i32 = arith.constant 0 : i32
    %c0_i32_0 = arith.constant 0 : i32
    %c0_i32_1 = arith.constant 0 : i32
    return %c0_i32, %c0_i32_0 : i32, i32
  }
  func.func @transform_9(%arg0: i32) -> (i32, i32) {
    %c0_i32 = arith.constant 0 : i32
    %c0_i32_0 = arith.constant 0 : i32
    %c0_i32_1 = arith.constant 0 : i32
    return %c0_i32, %c0_i32_0 : i32, i32
  }
  func.func @transform_10(%arg0: i32) -> (i32, i32) {
    %c0_i32 = arith.constant 0 : i32
    %c0_i32_0 = arith.constant 0 : i32
    %c0_i32_1 = arith.constant 0 : i32
    return %c0_i32, %c0_i32_0 : i32, i32
  }
  func.func @transform_11(%arg0: i32) -> (i32, i32) {
    %c0_i32 = arith.constant 0 : i32
    %c0_i32_0 = arith.constant 0 : i32
    %c0_i32_1 = arith.constant 0 : i32
    return %c0_i32, %c0_i32_0 : i32, i32
  }
  func.func @transform_12(%arg0: i32) -> (i32, i32) {
    %c0_i32 = arith.constant 0 : i32
    %c0_i32_0 = arith.constant 0 : i32
    %c0_i32_1 = arith.constant 0 : i32
    return %c0_i32, %c0_i32_0 : i32, i32
  }
  func.func @transform_13(%arg0: i32) -> (i32, i32) {
    %c0_i32 = arith.constant 0 : i32
    %c0_i32_0 = arith.constant 0 : i32
    %c0_i32_1 = arith.constant 0 : i32
    return %c0_i32, %c0_i32_0 : i32, i32
  }
  func.func @transform_14(%arg0: i32) -> (i32, i32) {
    %c0_i32 = arith.constant 0 : i32
    %c0_i32_0 = arith.constant 0 : i32
    %c0_i32_1 = arith.constant 0 : i32
    return %c0_i32, %c0_i32_0 : i32, i32
  }
  func.func @transform_15(%arg0: i32) -> (i32, i32, i32) {
    %c0_i32 = arith.constant 0 : i32
    %c0_i32_0 = arith.constant 0 : i32
    %c0_i32_1 = arith.constant 0 : i32
    return %arg0, %c0_i32, %c0_i32_0 : i32, i32, i32
  }
}

</mosaic_0001>

<bundles_post_ra>
// kernel: tpu_custom_call.1
= control target key start
LH: loop header
LB: loop body
LE: loop exit
PB: predicated region body
PF: predicated region fallthrough
CT: control target
= control target key end

     0   :  { %s3296_s0 = inlined_call_operand.hbm [shape: f32[2,8,64], index: 0, kind: input, shape index: {}]   ;;  %s3297_s1 = inlined_call_operand.vmem [shape: bf16[64,192], index: 1, kind: input, shape index: {}]   ;;  %s3298_s2 = inlined_call_operand.vmem [shape: f32[1,192], index: 2, kind: input, shape index: {}]   ;;  %s3299_s3 = inlined_call_operand.vmem [shape: bf16[64,64], index: 3, kind: input, shape index: {}]   ;;  %s3300_s4 = inlined_call_operand.vmem [shape: f32[1,64], index: 4, kind: input, shape index: {}]   ;;  %s3301_s5 = inlined_call_operand.vmem [shape: f32[1,64], index: 5, kind: input, shape index: {}]   ;;  %s3302_s6 = inlined_call_operand.vmem [shape: f32[1,64], index: 6, kind: input, shape index: {}]   ;;  %s3303_s7 = inlined_call_operand.vmem [shape: bf16[64,256], index: 7, kind: input, shape index: {}]   ;;  %s3304_s8 = inlined_call_operand.vmem [shape: f32[1,256], index: 8, kind: input, shape index: {}]   ;;  %s3305_s9 = inlined_call_operand.vmem [shape: bf16[256,64], index: 9, kind: input, shape index: {}]   ;;  %s3306_s10 = inlined_call_operand.vmem [shape: f32[1,64], index: 10, kind: input, shape index: {}]   ;;  %s3307_s11 = inlined_call_operand.vmem [shape: f32[1,64], index: 11, kind: input, shape index: {}]   ;;  %s3308_s12 = inlined_call_operand.vmem [shape: f32[1,64], index: 12, kind: input, shape index: {}]   ;;  %s3309_s13 = inlined_call_operand.vmem [shape: bf16[64,128], index: 13, kind: input, shape index: {}]   ;;  %s3310_s14 = inlined_call_operand.vmem [shape: f32[1,128], index: 14, kind: input, shape index: {}]   ;;  %s3311_s15 = inlined_call_operand.hbm [shape: f32[2,8,128], index: 15, kind: output, shape index: {}]  }
   0x1   :  { %3324 = sst [smem:[#allocation13_spill]] %s3311_s15 }
   0x2   :  { %20 = vsyncpa [#allocation3], 0 }
   0x3   :  { %22 = vsyncpa [#allocation3 + $0x1], 0 }
   0x4   :  { %23 = vsyncpa [#allocation4], 0 }
   0x5   :  { %25 = vsyncpa [#allocation4 + $0x1], 0  ;;  %s2754_s18 = smov 0   ;;  %s2756_s19 = smov 0  }
   0x6   :  { %s2758_s20 = smov 0   ;;  %s2760_s21 = smov 0  }
   0x7 LB: > { %3325 = sst [smem:[#allocation8_spill]] %s2639_s18  ;;  %s2775_s22 = sadd.s32 4294967295, %s2651_s21   ;;  %s2651_s21 = sphi %s2760_s21, %s3347_s21   ;;  %s2647_s20 = sphi %s2758_s20, %s3349_s20   ;;  %s2643_s19 = sphi %s2756_s19, %s3351_s19   ;;  %s2639_s18 = sphi %s2754_s18, %s3350_s18  }
   0x8   : > { %3326 = sst [smem:[#allocation9_spill]] %s2647_s20  ;;  %s2143_s23 = sadd.s32 4294967294, %s2651_s21  }
   0x9   : > { %s2779_s24 = sadd.s32 1, %s2651_s21   ;;  %s38_s25 = sadd.s32 1, %s2647_s20 }
   0xa   : > { %3327 = sst [smem:[#allocation10_spill]] %s2779_s24  ;;  %s35_s26 = ssub.s32 %s2651_s21, %s2779_s24 }
   0xb   : > { %p45_p0 = scmp.ne.s32.totalorder %s2647_s20, %s2643_s19  ;;  %p36_p1 = scmp.eq.s32.totalorder %s35_s26, 0 }
   0xc   : > { %p46_p2 = scmp.eq.s32.totalorder %s2651_s21, 0  ;;  %p51_p3 = scmp.ne.s32.totalorder %s2643_s19, %s2639_s18 }
   0xd   : > { %p52_p4 = scmp.eq.s32.totalorder %s2775_s22, 0  ;;  %p369_p7 = scmp.eq.s32.totalorder %s2775_s22, 1 }
   0xe   : > { %s2791_s27 = scalar_select %p36_p1, %s2647_s20, %s38_s25  }
   0xf   : > { %p2793_p5 = por %p46_p2, %p45_p0  ;;  %p2797_p6 = por %p52_p4, %p51_p3 }
  0x10   : > { %3328 = sst [smem:[#allocation11_spill]] %s2791_s27  ;;  %p375_p8 = scmp.eq.s32.totalorder %s2143_s23, 1 }
  0x11   : > { %p2418_p10 = scmp.lt.s32.totalorder %s2651_s21, 2  ;;  %p2804_p11 = por %p369_p7, %p45_p0 }
  0x12   : > { %p2808_p12 = por %p375_p8, %p51_p3  ;;  %s437_s17 = sand.u32 1, %s2647_s20  }
  0x13   : > { %s3331_s30 = scalar_select %p2804_p11, 1, 0 }
  0x14   : > { %s3333_s16 = scalar_select %p2808_p12, 1, 0 }
  0x15   : > { %3332 = sst [smem:[#allocation12_spill]] %s3331_s30  ;;  %s2147_s25 = sshll.u32 %s2651_s21, 7 }
  0x16   : > { %s2146_s26 = sshll.u32 %s437_s17, 3  ;;  %s2817_s18 = scalar_lea.hbm %s3296_s0, %s2147_s25 }
  0x17   : > { %s441_s23 = scalar_lea.vmem [#allocation2], %s2146_s26  ;;  %p2821_p13 = pnand %p2418_p10, %p2793_p5 }
  0x18   : > { %s448_s15 = sshll.u32 %s441_s23, 4  ;;  %s438_s24 = scalar_lea.sflag [#allocation3], %s437_s17  ;;  %s2825_s15 = int_to_ptr.vmem [resolvable:$true] %s448_s15 }
  0x19   : > { %s2555_s27 = scalar_lea.hbm %s2817_s18, 128  ;;  %p2557_p3 = pneg %p2821_p13 }
  0x1a   : > { %p2556_p2 = scmp.ne.s32.totalorder %s2817_s18, %s2555_s27  ;;  %s2560_s26 = scalar_lea.hbm %s3296_s0, 256 }
  0x1b   : > { %p2561_p5 = scmp.lt.u32.totalorder %s2817_s18, %s3296_s0  ;;  %p2562_p8 = scmp.lt.u32.totalorder %s2560_s26, %s2555_s27 }
  0x1c   : > { %p2558_p4 = pnand %p2557_p3, %p2556_p2  ;;  %p2564_p9 = scmp.lt.u32.totalorder %s2555_s27, %s2817_s18 }
  0x1d   : > { %p2563_p10 = por %p2562_p8, %p2561_p5 }
  0x1e   : > { %p2559_p7 = pneg %p2558_p4 }
  0x1f   : > { %p2565_p0 = por %p2564_p9, %p2563_p10 }
  0x21   : > { %p2566_p1 = pnand %p2565_p0, %p2559_p7 }
  0x23   : > { %2569 = shalt.err (!%p2566_p1)
}
  0x24   : > { %s2570_s17 = scalar_lea.vmem %s2825_s15, 128  ;;  %s2653_s28 = smov [#allocation2]  }
  0x25   : > { %p2571_p2 = scmp.ne.s32.totalorder %s2825_s15, %s2570_s17  ;;  %s2575_s25 = sshll.u32 %s2653_s28, 4  ;;  %s2576_s25 = int_to_ptr.vmem [resolvable:$false] %s2575_s25 }
  0x26   : > { %s2577_s20 = scalar_lea.vmem %s2576_s25, 256  ;;  %p2578_p11 = scmp.lt.s32.totalorder %s2825_s15, %s2576_s25 }
  0x27   : > { %p2573_p4 = pnand %p2571_p2, %p2557_p3  ;;  %p2579_p5 = scmp.lt.s32.totalorder %s2577_s20, %s2570_s17 }
  0x29   : > { %p2574_p12 = pneg %p2573_p4  ;;  %p2580_p8 = por %p2579_p5, %p2578_p11 }
  0x2b   : > { %p2581_p9 = pnand %p2580_p8, %p2574_p12 }
  0x2d   : > { %2584 = shalt.err (!%p2581_p9)
}
  0x2e   : > { %2413 = dma.hbm_to_vmem [thread:$0]  (!%p2821_p13), %s2817_s18, 128, %s2825_s15, %s438_s24  }
  0x2f   : > { %p3335_p0 = scmp.lt.s32.totalorder %s2651_s21, 3  ;;  %p3336_p1 = scmp.ge.s32.totalorder %s2651_s21, 1 }
  0x31   : > { %p454_p3 = pnand %p3336_p1, %p3335_p0 }
  0x32   : > { %s2859_s27 = sand.u32 (!%p454_p3), 1, %s2643_s19  }
  0x33   : > { %457 = sbr.rel (%p454_p3) target bundleno = 3409 (0xd51), region = 80  ;;  %s3320_s26 = sshll.u32 (!%p454_p3), %s2859_s27, 3 }
  0x34   : > { %s460_s23 = scalar_lea.sflag (!%p454_p3), [#allocation3], %s2859_s27  ;;  %s463_s30 = scalar_lea.vmem (!%p454_p3), [#allocation2], %s3320_s26 }
  0x3a   : > { %2630 = dma.done.wait (%p2797_p6), %s460_s23, 128  }
  0x3b   : > { %2632 = vsyncadd (%p2797_p6), %s460_s23, 4294967168  ;;  %v2654_v0 = vmov 0   ;;  %v2471_v1 = vld [vmem:[%s3297_s1 + $0x4] ss:$8 sps:$4 sm:$0xff]   ;;  %v2473_v2 = vld [vmem:[%s3297_s1] ss:$8 sps:$4 sm:$0xff]   ;;  %v523_v11 = vlaneseq }
  0x3c   : > { %609 = vmatprep.mubr.bf16.mxu0 %v2654_v0  ;;  %577 = vmatprep.subr.bf16.mxu0 %v2471_v1  ;;  %v2474_v3 = vld [vmem:[%s3297_s1 + $0x14] ss:$8 sps:$4 sm:$0xff]   ;;  %v2476_v4 = vld [vmem:[%s3297_s1 + $0x10] ss:$8 sps:$4 sm:$0xff]   ;;  %v2477_v5 = vld [vmem:[%s3297_s1 + $0x24] ss:$8 sps:$4 sm:$0xff]  }
  0x3d   : > { %578 = vmatpush1.bf16.msra.mxu0 %v2473_v2  ;;  %v2479_v6 = vld [vmem:[%s3297_s1 + $0x20] ss:$8 sps:$4 sm:$0xff]   ;;  %v2480_v7 = vld [vmem:[%s3297_s1 + $0x34] ss:$8 sps:$4 sm:$0xff]   ;;  %v2482_v8 = vld [vmem:[%s3297_s1 + $0x30] ss:$8 sps:$4 sm:$0xff]  }
  0x3e   : > { %579 = vmatprep.subr.bf16.mxu0 %v2474_v3  ;;  %v2894_v9 = vld [vmem:[%s463_s30] sm:$0xff]  ;;  %vm573_vm0 = vcmask 523264   ;;  %v2899_v12 = vshrl.u32 %v523_v11, 7  ;;  %v2655_v13 = vmov 0.0   ;;  %vm2656_vm1 = vmmov 0   ;;  %s3321_s20 = smov 56  }
  0x3f   : > { %v512_v10 = vpack.c.bf16 %v2894_v9, %v2894_v9  ;;  %2286 = vmatprep.subr.bf16.mxu1 %v2655_v13  ;;  %v521_v15 = vld [vmem:[%s3298_s2] sm:$0x3]  ;;  %2288 = vmatprep.mubr.msk.bf16.mxu1 %vm2656_vm1, %v2655_v13  ;;  %s2658_s29 = smov 64   ;;  %vm629_vm2 = vcmask 64512   ;;  %vm691_vm3 = vcmask 1043456   ;;  %v621_v30 = vand.u32 127, %v523_v11 }
  0x40   : > { %v525_v14 = vsub.s32 0, %v2899_v12  ;;  %v529_v23 = vsub.s32 1, %v2899_v12  ;;  %v2659_v31 = vmov -1e+30   ;;  %s2660_s23 = smov 104   ;;  %s2661_s15 = smov 80  }
  0x41   : > { %580 = vmatpush1.bf16.msra.mxu0 %v2476_v4  ;;  %vm622_vm4 = vcmp.ge.s32.totalorder %v2899_v12, %v621_v30  ;;  %s2662_s18 = smov 72   ;;  %s2663_s24 = smov 120   ;;  %vm1535_vm5 = vcmask 130048   ;;  %vm1537_vm6 = vcmask 195584   ;;  %vm1539_vm7 = vcmask 261120  }
  0x42   : > { %581 = vmatprep.subr.bf16.mxu0 %v2477_v5  ;;  %v526_v16 = vrot.slane %v521_v15, %v525_v14  ;;  %v530_v24 = vrot.slane %v521_v15, %v529_v23  ;;  %v2933_v32 = vsel %vm622_vm4, 0.0, %v2659_v31  ;;  %s3322_s17 = smov 48   ;;  %s2665_s28 = smov 112   ;;  %vm1541_vm8 = vcmask 326656  }
  0x43   : > { %s3323_s25 = smov 40   ;;  %s2667_s26 = smov 32   ;;  %vm1543_vm9 = vcmask 392192   ;;  %vm1545_vm10 = vcmask 457728  }
  0x44   : > { %s2668_s30 = smov 96  }
  0x45   : > { %582 = vmatpush1.bf16.msra.mxu0 %v2479_v6 }
  0x46   : > { %583 = vmatprep.subr.bf16.mxu0 %v2480_v7 }
  0x49   : > { %584 = vmatpush1.bf16.msra.mxu0 %v2482_v8 }
  0x4a   : > { %2310 = vmatprep.subr.bf16.mxu0 %v2655_v13 }
  0x4c   : > { %2159 = vmatmul.mubr.msk.bf16.vlgmr.msra.gmra.mrb[0].mxu0 %vm573_vm0, %v512_v10 }
  0x4d   : > { %2312 = vmatprep.mubr.msk.bf16.mxu0 %vm2656_vm1, %v2655_v13 }
 0x11f   : > { %v611_v17 = vpop.f32.mrb[0].mxu0 }
 0x120   : > { %v612_v18 = vadd.f32 %v611_v17, %v526_v16  ;;  %v613_v19 = vpop.f32.mrb[1].mxu0 }
 0x121   : > { %v615_v20 = vpop.f32.mrb[2].mxu0  ;;  %v614_v26 = vadd.f32 %v613_v19, %v530_v24 }
 0x122   : > { %v2913_v21 = vpack.c.bf16 %v612_v18, %v612_v18  ;;  %v616_v22 = vpop.f32.mrb[3].mxu0 }
 0x123   : > { %v2923_v28 = vpack.c.bf16 %v614_v26, %v614_v26 }
 0x124   : > { %737 = vrot.lane.b32.xlu1 %v2913_v21, %s3321_s20  ;;  %627 = vrot.lane.b32.xlu0 %v2913_v21, %s2658_s29  ;;  %s2669_s29 = smov 24   ;;  %s2670_s20 = smov 88  }
 0x125   : > { %v693_v29 = vsel %vm691_vm3, %v2923_v28, 0 }
 0x196   : > { %v628_v25 = vpop.permute.xlu0 %627  ;;  %v738_v44 = vpop.permute.xlu1 %737 }
 0x197   : > { %v634_v27 = vsel %vm629_vm2, %v628_v25, 0  ;;  %v743_v53 = vsel %vm629_vm2, %v738_v44, 0 }
 0x198   : > { %2287 = vmatpush3.bf16.xpose.msra.mxu1 %v634_v27 }
 0x199   : > { %2292 = vmatprep.subr.bf16.mxu1 %v2655_v13 }
 0x19f   : > { %2289 = vmatmul.mubr.msk.bf16.vlgmr.msra.gmra.mrb[0].mxu1 %vm629_vm2, %v2913_v21 }
 0x1a0   : > { %2293 = vmatpush3.bf16.msra.mxu1 %v693_v29  ;;  %2294 = vmatprep.mubr.msk.bf16.mxu1 %vm2656_vm1, %v2655_v13 }
 0x1a1   : > { %2298 = vmatprep.subr.bf16.mxu1 %v2655_v13 }
 0x272   : > { %v670_v33 = vpop.f32.mrb[0].mxu1 }
 0x273   : > { %v671_v34 = vadd.f32 %v670_v33, %v2933_v32  ;;  %v2290_v35 = vpop.f32.mrb[1].mxu1 }
 0x274   : > { %v673_v36 = vpop.f32.mrb[2].mxu1 }
 0x275   : > { %v2291_v37 = vpop.f32.mrb[3].mxu1  ;;  %v676_v38 = vsel %vm629_vm2, %v671_v34, -inf }
 0x276   : > { %677 = vmax.xlane.f32.xlu0 %v676_v38 }
 0x28c   : > { %956 = vrot.lane.b32.xlu0 %v2913_v21, %s2660_s23 }
 0x290   : > { %1286 = vrot.lane.b32.xlu0 %v2913_v21, %s2661_s15 }
 0x294   : > { %1396 = vrot.lane.b32.xlu0 %v2913_v21, %s2662_s18 }
 0x303   : > { %v678_v39 = vpop.xlane.xlu0 %677 }
 0x304   : > { %v679_v40 = vsub.f32 %v671_v34, %v678_v39 }
 0x306   : > { %v680_v41 = vmul.f32 1.442695, %v679_v40 }
 0x307   : > { %v957_v57 = vpop.permute.xlu0 %956 }
 0x308   : > { %2519 = vpow2.f32 %v680_v41 }
 0x30b   : > { %v1287_v3 = vpop.permute.xlu0 %1286 }
 0x30f   : > { %v1397_v5 = vpop.permute.xlu0 %1396 }
 0x312   : > { %v2520_v42 = vpop.eup %2519 }
 0x313   : > { %v682_v43 = vsel %vm629_vm2, %v2520_v42, 0.0 }
 0x314   : > { %683 = vadd.xlane.f32.xlu1 %v682_v43 }
 0x325   : > { %735 = vrot.lane.b32.xlu1 %v2913_v21, %s2663_s24 }
 0x329   : > { %848 = vrot.lane.b32.xlu1 %v2913_v21, %s3322_s17  ;;  %s2671_s17 = smov 16  }
 0x32d   : > { %846 = vrot.lane.b32.xlu1 %v2913_v21, %s2665_s28 }
 0x331   : > { %958 = vrot.lane.b32.xlu1 %v2913_v21, %s3323_s25  ;;  %s2672_s25 = smov 8  }
 0x335   : > { %1068 = vrot.lane.b32.xlu1 %v2913_v21, %s2667_s26 }
 0x339   : > { %1066 = vrot.lane.b32.xlu1 %v2913_v21, %s2668_s30 }
 0x33d   : > { %1178 = vrot.lane.b32.xlu1 %v2913_v21, %s2669_s29 }
 0x341   : > { %1176 = vrot.lane.b32.xlu1 %v2913_v21, %s2670_s20 }
 0x345   : > { %1288 = vrot.lane.b32.xlu1 %v2913_v21, %s2671_s17 }
 0x349   : > { %1398 = vrot.lane.b32.xlu1 %v2913_v21, %s2672_s25 }
 0x3a1   : > { %v684_v45 = vpop.xlane.xlu1 %683 }
 0x3a2   : > { %2521 = vrcp.f32 %v684_v45 }
 0x3a5   : > { %v736_v46 = vpop.permute.xlu1 %735 }
 0x3a9   : > { %v849_v47 = vpop.permute.xlu1 %848 }
 0x3aa   : > { %v854_v48 = vsel %vm629_vm2, %v849_v47, 0 }
 0x3ab   : > { %2311 = vmatpush3.bf16.xpose.msra.mxu0 %v854_v48 }
 0x3ac   : > { %v2522_v49 = vpop.eup %2521  ;;  %2322 = vmatprep.subr.bf16.mxu0 %v2655_v13 }
 0x3ad   : > { %v686_v50 = vmul.f32 %v2522_v49, %v2520_v42  ;;  %v847_v51 = vpop.permute.xlu1 %846 }
 0x3af   : > { %v687_v52 = vpack.c.bf16 %v686_v50, %v686_v50 }
 0x3b1   : > { %2295 = vmatmul.mubr.msk.bf16.vlgmr.msra.gmra.mrb[4].mxu1 %vm629_vm2, %v687_v52  ;;  %v959_v54 = vpop.permute.xlu1 %958 }
 0x3b2   : > { %2299 = vmatpush3.bf16.xpose.msra.mxu1 %v743_v53  ;;  %v964_v55 = vsel %vm629_vm2, %v959_v54, 0  ;;  %2313 = vmatmul.mubr.msk.bf16.vlgmr.msra.gmra.mrb[4].mxu0 %vm629_vm2, %v847_v51 }
 0x3b3   : > { %2323 = vmatpush3.bf16.xpose.msra.mxu0 %v964_v55  ;;  %2300 = vmatprep.mubr.msk.bf16.mxu1 %vm2656_vm1, %v2655_v13 }
 0x3b4   : > { %2324 = vmatprep.mubr.msk.bf16.mxu0 %vm2656_vm1, %v2655_v13  ;;  %2334 = vmatprep.subr.bf16.mxu0 %v2655_v13 }
 0x3b5   : > { %v1069_v56 = vpop.permute.xlu1 %1068  ;;  %2304 = vmatprep.subr.bf16.mxu1 %v2655_v13 }
 0x3b6   : > { %v1074_v59 = vsel %vm629_vm2, %v1069_v56, 0 }
 0x3b9   : > { %2301 = vmatmul.mubr.msk.bf16.vlgmr.msra.gmra.mrb[8].mxu1 %vm629_vm2, %v736_v46  ;;  %v1067_v58 = vpop.permute.xlu1 %1066 }
 0x3ba   : > { %2325 = vmatmul.mubr.msk.bf16.vlgmr.msra.gmra.mrb[8].mxu0 %vm629_vm2, %v957_v57  ;;  %2306 = vmatprep.mubr.msk.bf16.mxu1 %vm2656_vm1, %v2655_v13 }
 0x3bb   : > { %2335 = vmatpush3.bf16.xpose.msra.mxu0 %v1074_v59  ;;  %2336 = vmatprep.mubr.msk.bf16.mxu0 %vm2656_vm1, %v2655_v13 }
 0x3bc   : > { %2346 = vmatprep.subr.bf16.mxu0 %v2655_v13 }
 0x3bd   : > { %v1179_v60 = vpop.permute.xlu1 %1178 }
 0x3be   : > { %v1184_v62 = vsel %vm629_vm2, %v1179_v60, 0 }
 0x3c1   : > { %v1177_v61 = vpop.permute.xlu1 %1176 }
 0x3c2   : > { %2337 = vmatmul.mubr.msk.bf16.vlgmr.msra.gmra.mrb[12].mxu0 %vm629_vm2, %v1067_v58 }
 0x3c3   : > { %2347 = vmatpush3.bf16.xpose.msra.mxu0 %v1184_v62  ;;  %2348 = vmatprep.mubr.msk.bf16.mxu0 %vm2656_vm1, %v2655_v13 }
 0x3c4   : > { %2358 = vmatprep.subr.bf16.mxu0 %v2655_v13 }
 0x3c5   : > { %v1289_v63 = vpop.permute.xlu1 %1288 }
 0x3c6   : > { %v1294_v1 = vsel %vm629_vm2, %v1289_v63, 0 }
 0x3c9   : > { %v1399_v2 = vpop.permute.xlu1 %1398 }
 0x3ca   : > { %2349 = vmatmul.mubr.msk.bf16.vlgmr.msra.gmra.mrb[16].mxu0 %vm629_vm2, %v1177_v61  ;;  %v1404_v4 = vsel %vm629_vm2, %v1399_v2, 0 }
 0x3cb   : > { %2359 = vmatpush3.bf16.xpose.msra.mxu0 %v1294_v1  ;;  %2360 = vmatprep.mubr.msk.bf16.mxu0 %vm2656_vm1, %v2655_v13 }
 0x3cc   : > { %2370 = vmatprep.subr.bf16.mxu0 %v2655_v13 }
 0x3d2   : > { %2361 = vmatmul.mubr.msk.bf16.vlgmr.msra.gmra.mrb[20].mxu0 %vm629_vm2, %v1287_v3 }
 0x3d3   : > { %2371 = vmatpush3.bf16.xpose.msra.mxu0 %v1404_v4  ;;  %2372 = vmatprep.mubr.msk.bf16.mxu0 %vm2656_vm1, %v2655_v13 }
 0x3d4   : > { %2382 = vmatprep.subr.bf16.mxu0 %v2655_v13 }
 0x3da   : > { %2373 = vmatmul.mubr.msk.bf16.vlgmr.msra.gmra.mrb[24].mxu0 %vm629_vm2, %v1397_v5 }
 0x3db   : > { %2390 = vmatprep.mubr.msk.bf16.mxu0 %vm2656_vm1, %v2655_v13 }
 0x484   : > { %v3002_v6 = vpop.f32.mrb[4].mxu1 }
 0x485   : > { %v2296_v7 = vpop.f32.mrb[5].mxu1  ;;  %v890_v8 = vpop.f32.mrb[4].mxu0 }
 0x486   : > { %v891_v10 = vadd.f32 %v890_v8, %v2933_v32  ;;  %v732_v11 = vpop.f32.mrb[6].mxu1  ;;  %v2314_v15 = vpop.f32.mrb[5].mxu0 }
 0x487   : > { %v2297_v16 = vpop.f32.mrb[7].mxu1  ;;  %v893_v17 = vpop.f32.mrb[6].mxu0 }
 0x488   : > { %v2315_v18 = vpop.f32.mrb[7].mxu0  ;;  %v896_v19 = vsel %vm629_vm2, %v891_v10, -inf }
 0x489   : > { %897 = vmax.xlane.f32.xlu0 %v896_v19 }
 0x48c   : > { %v779_v20 = vpop.f32.mrb[8].mxu1 }
 0x48d   : > { %v780_v21 = vadd.f32 %v779_v20, %v2933_v32  ;;  %v2302_v22 = vpop.f32.mrb[9].mxu1  ;;  %v1000_v24 = vpop.f32.mrb[8].mxu0 }
 0x48e   : > { %v1001_v25 = vadd.f32 %v1000_v24, %v2933_v32  ;;  %v782_v26 = vpop.f32.mrb[10].mxu1  ;;  %v2326_v27 = vpop.f32.mrb[9].mxu0 }
 0x48f   : > { %v2303_v29 = vpop.f32.mrb[11].mxu1  ;;  %v1003_v30 = vpop.f32.mrb[10].mxu0  ;;  %v785_v31 = vsel %vm629_vm2, %v780_v21, -inf }
 0x490   : > { %v2327_v33 = vpop.f32.mrb[11].mxu0  ;;  %786 = vmax.xlane.f32.xlu1 %v785_v31  ;;  %v1006_v34 = vsel %vm629_vm2, %v1001_v25, -inf }
 0x491   : > { %1007 = vmax.xlane.f32.xlu0 %v1006_v34 }
 0x495   : > { %v1110_v35 = vpop.f32.mrb[12].mxu0 }
 0x496   : > { %v1111_v36 = vadd.f32 %v1110_v35, %v2933_v32  ;;  %v2338_v37 = vpop.f32.mrb[13].mxu0 }
 0x497   : > { %v1113_v38 = vpop.f32.mrb[14].mxu0 }
 0x498   : > { %v2339_v39 = vpop.f32.mrb[15].mxu0  ;;  %v1116_v40 = vsel %vm629_vm2, %v1111_v36, -inf }
 0x499   : > { %1117 = vmax.xlane.f32.xlu1 %v1116_v40 }
 0x49d   : > { %v1220_v41 = vpop.f32.mrb[16].mxu0 }
 0x49e   : > { %v1221_v42 = vadd.f32 %v1220_v41, %v2933_v32  ;;  %v2350_v43 = vpop.f32.mrb[17].mxu0 }
 0x49f   : > { %v1223_v44 = vpop.f32.mrb[18].mxu0 }
 0x4a0   : > { %v2351_v45 = vpop.f32.mrb[19].mxu0  ;;  %v1226_v46 = vsel %vm629_vm2, %v1221_v42, -inf }
 0x4a1   : > { %1227 = vmax.xlane.f32.xlu0 %v1226_v46 }
 0x4a5   : > { %v1330_v47 = vpop.f32.mrb[20].mxu0 }
 0x4a6   : > { %v1331_v48 = vadd.f32 %v1330_v47, %v2933_v32  ;;  %v2362_v49 = vpop.f32.mrb[21].mxu0 }
 0x4a7   : > { %v1333_v50 = vpop.f32.mrb[22].mxu0 }
 0x4a8   : > { %v2363_v51 = vpop.f32.mrb[23].mxu0  ;;  %v1336_v52 = vsel %vm629_vm2, %v1331_v48, -inf }
 0x4a9   : > { %1337 = vmax.xlane.f32.xlu1 %v1336_v52 }
 0x4ad   : > { %v1440_v53 = vpop.f32.mrb[24].mxu0 }
 0x4ae   : > { %v1441_v54 = vadd.f32 %v1440_v53, %v2933_v32  ;;  %v2374_v55 = vpop.f32.mrb[25].mxu0 }
 0x4af   : > { %v1443_v56 = vpop.f32.mrb[26].mxu0 }
 0x4b0   : > { %v2375_v57 = vpop.f32.mrb[27].mxu0  ;;  %v1446_v58 = vsel %vm629_vm2, %v1441_v54, -inf }
 0x4b1   : > { %1447 = vmax.xlane.f32.xlu0 %v1446_v58 }
 0x516   : > { %v898_v59 = vpop.xlane.xlu0 %897 }
 0x517   : > { %v899_v60 = vsub.f32 %v891_v10, %v898_v59 }
 0x519   : > { %v900_v61 = vmul.f32 1.442695, %v899_v60 }
 0x51b   : > { %2523 = vpow2.f32 %v900_v61 }
 0x51d   : > { %v787_v62 = vpop.xlane.xlu1 %786 }
 0x51e   : > { %v788_v63 = vsub.f32 %v780_v21, %v787_v62  ;;  %v1008_v1 = vpop.xlane.xlu0 %1007 }
 0x51f   : > { %v1009_v2 = vsub.f32 %v1001_v25, %v1008_v1 }
 0x520   : > { %v789_v3 = vmul.f32 1.442695, %v788_v63 }
 0x521   : > { %v1010_v4 = vmul.f32 1.442695, %v1009_v2 }
 0x523   : > { %2525 = vpow2.f32 %v1010_v4 }
 0x524   : > { %2527 = vpow2.f32 %v789_v3 }
 0x525   : > { %v3018_v5 = vpop.eup %2523 }
 0x526   : > { %v1118_v32 = vpop.xlane.xlu1 %1117  ;;  %v902_v7 = vsel %vm629_vm2, %v3018_v5, 0.0 }
 0x527   : > { %v1119_v8 = vsub.f32 %v1111_v36, %v1118_v32  ;;  %903 = vadd.xlane.f32.xlu0 %v902_v7 }
 0x529   : > { %v1120_v11 = vmul.f32 1.442695, %v1119_v8 }
 0x52b   : > { %2529 = vpow2.f32 %v1120_v11 }
 0x52d   : > { %v3022_v10 = vpop.eup %2525 }
 0x52e   : > { %v1228_v15 = vpop.xlane.xlu0 %1227  ;;  %v1012_v16 = vsel %vm629_vm2, %v3022_v10, 0.0  ;;  %v2528_v17 = vpop.eup %2527 }
 0x52f   : > { %v1229_v18 = vsub.f32 %v1221_v42, %v1228_v15  ;;  %1013 = vadd.xlane.f32.xlu1 %v1012_v16  ;;  %v791_v20 = vsel %vm629_vm2, %v2528_v17, 0.0 }
 0x531   : > { %v1230_v19 = vmul.f32 1.442695, %v1229_v18 }
 0x533   : > { %2531 = vpow2.f32 %v1230_v19  ;;  %792 = vadd.xlane.f32.xlu1 %v791_v20 }
 0x535   : > { %v3027_v21 = vpop.eup %2529 }
 0x536   : > { %v1122_v22 = vsel %vm629_vm2, %v3027_v21, 0.0  ;;  %v1338_v26 = vpop.xlane.xlu1 %1337 }
 0x537   : > { %1123 = vadd.xlane.f32.xlu0 %v1122_v22  ;;  %v1339_v27 = vsub.f32 %v1331_v48, %v1338_v26 }
 0x539   : > { %v1340_v29 = vmul.f32 1.442695, %v1339_v27 }
 0x53b   : > { %2533 = vpow2.f32 %v1340_v29 }
 0x53d   : > { %v3031_v24 = vpop.eup %2531 }
 0x53e   : > { %v1232_v25 = vsel %vm629_vm2, %v3031_v24, 0.0  ;;  %v1448_v30 = vpop.xlane.xlu0 %1447 }
 0x53f   : > { %1233 = vadd.xlane.f32.xlu0 %v1232_v25  ;;  %v1449_v31 = vsub.f32 %v1441_v54, %v1448_v30 }
 0x541   : > { %v1450_v34 = vmul.f32 1.442695, %v1449_v31 }
 0x543   : > { %2535 = vpow2.f32 %v1450_v34 }
 0x544   : > { %798 = vrot.lane.b32.xlu1 %v2923_v28, %s2663_s24 }
 0x545   : > { %v3041_v33 = vpop.eup %2533 }
 0x546   : > { %v1342_v35 = vsel %vm629_vm2, %v3041_v33, 0.0 }
 0x54d   : > { %v3045_v36 = vpop.eup %2535 }
 0x54e   : > { %v1452_v37 = vsel %vm629_vm2, %v3045_v36, 0.0 }
 0x555   : > { %908 = vrot.lane.b32.xlu0 %v2923_v28, %s2665_s28  ;;  %s3337_s28 = smov 40  }
 0x559   : > { %1018 = vrot.lane.b32.xlu0 %v2923_v28, %s2660_s23 }
 0x568   : > { %1343 = vadd.xlane.f32.xlu1 %v1342_v35 }
 0x578   : > { %1453 = vadd.xlane.f32.xlu0 %v1452_v37 }
 0x579   : > { %1128 = vrot.lane.b32.xlu1 %v2923_v28, %s2668_s30  ;;  %s3338_s30 = smov 48  }
 0x57d   : > { %1348 = vrot.lane.b32.xlu1 %v2923_v28, %s2661_s15  ;;  %s3342_s15 = sld [smem:[#allocation13_spill]] }
 0x581   : > { %1458 = vrot.lane.b32.xlu1 %v2923_v28, %s2662_s18 }
 0x58e   : > { %1238 = vrot.lane.b32.xlu0 %v2923_v28, %s2670_s20 }
 0x5b4   : > { %v904_v40 = vpop.xlane.xlu0 %903 }
 0x5bc   : > { %v1014_v38 = vpop.xlane.xlu1 %1013 }
 0x5c0   : > { %v793_v39 = vpop.xlane.xlu1 %792 }
 0x5c1   : > { %2537 = vrcp.f32 %v793_v39  ;;  %v2484_v39 = vld [vmem:[%s3299_s3 + $0x8] sm:$0xff]  }
 0x5c2   : > { %2539 = vrcp.f32 %v904_v40  ;;  %v2485_v40 = vld [vmem:[%s3299_s3 + $0x10] sm:$0xff]  }
 0x5c3   : > { %2541 = vrcp.f32 %v1014_v38  ;;  %v2483_v38 = vld [vmem:[%s3299_s3] sm:$0xff]  }
 0x5c4   : > { %v799_v41 = vpop.permute.xlu1 %798  ;;  %v1124_v43 = vpop.xlane.xlu0 %1123  ;;  %2383 = vmatpush3.bf16.msra.mxu0 %v2483_v38  ;;  %v2507_v38 = vld [vmem:[%s3305_s9 + $0x60] sm:$0xff]  }
 0x5c5   : > { %v804_v42 = vsel %vm691_vm3, %v799_v41, 0  ;;  %2543 = vrcp.f32 %v1124_v43  ;;  %2384 = vmatprep.subr.bf16.mxu0 %v2655_v13 }
 0x5c6   : > { %2305 = vmatpush3.bf16.msra.mxu1 %v804_v42 }
 0x5c7   : > { %2316 = vmatprep.subr.bf16.mxu1 %v2655_v13 }
 0x5c8   : > { %2385 = vmatpush3.bf16.msra.mxu0 %v2484_v39  ;;  %v2508_v39 = vld [vmem:[%s3305_s9 + $0x20] sm:$0xff]  }
 0x5c9   : > { %2386 = vmatprep.subr.bf16.mxu0 %v2655_v13 }
 0x5cb   : > { %v2538_v44 = vpop.eup %2537 }
 0x5cc   : > { %v795_v45 = vmul.f32 %v2538_v44, %v2528_v17  ;;  %v1234_v46 = vpop.xlane.xlu0 %1233  ;;  %v2540_v48 = vpop.eup %2539  ;;  %2387 = vmatpush3.bf16.msra.mxu0 %v2485_v40  ;;  %v2509_v40 = vld [vmem:[%s3305_s9 + $0x68] sm:$0xff]  }
 0x5cd   : > { %v906_v50 = vmul.f32 %v2540_v48, %v3018_v5  ;;  %v2542_v53 = vpop.eup %2541  ;;  %2545 = vrcp.f32 %v1234_v46  ;;  %2388 = vmatprep.subr.bf16.mxu0 %v2655_v13 }
 0x5ce   : > { %v796_v47 = vpack.c.bf16 %v795_v45, %v795_v45  ;;  %v1016_v55 = vmul.f32 %v2542_v53, %v3022_v10  ;;  %v2486_v45 = vld [vmem:[%s3299_s3 + $0x18] sm:$0xff]  }
 0x5cf   : > { %v907_v52 = vpack.c.bf16 %v906_v50, %v906_v50  ;;  %v2544_v57 = vpop.eup %2543 }
 0x5d0   : > { %v909_v49 = vpop.permute.xlu0 %908  ;;  %2307 = vmatmul.mubr.msk.bf16.vlgmr.msra.gmra.mrb[12].mxu1 %vm629_vm2, %v796_v47  ;;  %v1017_v56 = vpack.c.bf16 %v1016_v55, %v1016_v55  ;;  %v1126_v59 = vmul.f32 %v2544_v57, %v3027_v21  ;;  %2389 = vmatpush3.bf16.msra.mxu0 %v2486_v45 }
 0x5d1   : > { %v914_v28 = vsel %vm691_vm3, %v909_v49, 0  ;;  %2318 = vmatprep.mubr.msk.bf16.mxu1 %vm2656_vm1, %v2655_v13 }
 0x5d2   : > { %2317 = vmatpush3.bf16.msra.mxu1 %v914_v28  ;;  %v1127_v62 = vpack.c.bf16 %v1126_v59, %v1126_v59 }
 0x5d3   : > { %2328 = vmatprep.subr.bf16.mxu1 %v2655_v13 }
 0x5d4   : > { %v1019_v51 = vpop.permute.xlu0 %1018 }
 0x5d5   : > { %v1024_v54 = vsel %vm691_vm3, %v1019_v51, 0 }
 0x5d7   : > { %v2546_v63 = vpop.eup %2545 }
 0x5d8   : > { %2319 = vmatmul.mubr.msk.bf16.vlgmr.msra.gmra.mrb[16].mxu1 %vm629_vm2, %v907_v52  ;;  %v1236_v2 = vmul.f32 %v2546_v63, %v3031_v24 }
 0x5d9   : > { %2329 = vmatpush3.bf16.msra.mxu1 %v1024_v54  ;;  %2330 = vmatprep.mubr.msk.bf16.mxu1 %vm2656_vm1, %v2655_v13 }
 0x5da   : > { %2340 = vmatprep.subr.bf16.mxu1 %v2655_v13  ;;  %v1237_v32 = vpack.c.bf16 %v1236_v2, %v1236_v2 }
 0x5e0   : > { %2331 = vmatmul.mubr.msk.bf16.vlgmr.msra.gmra.mrb[20].mxu1 %vm629_vm2, %v1017_v56 }
 0x5e1   : > { %2342 = vmatprep.mubr.msk.bf16.mxu1 %vm2656_vm1, %v2655_v13 }
 0x5f5   : > { %v1344_v58 = vpop.xlane.xlu1 %1343 }
 0x5f6   : > { %2547 = vrcp.f32 %v1344_v58 }
 0x5f9   : > { %v1129_v60 = vpop.permute.xlu1 %1128 }
 0x5fa   : > { %v1134_v61 = vsel %vm691_vm3, %v1129_v60, 0 }
 0x5fb   : > { %2341 = vmatpush3.bf16.msra.mxu1 %v1134_v61 }
 0x5fc   : > { %2352 = vmatprep.subr.bf16.mxu1 %v2655_v13 }
 0x5fd   : > { %v1349_v5 = vpop.permute.xlu1 %1348 }
 0x5fe   : > { %2343 = vmatmul.mubr.msk.bf16.vlgmr.msra.gmra.mrb[24].mxu1 %vm629_vm2, %v1127_v62  ;;  %v1354_v8 = vsel %vm691_vm3, %v1349_v5, 0 }
 0x5ff   : > { %2354 = vmatprep.mubr.msk.bf16.mxu1 %vm2656_vm1, %v2655_v13 }
 0x600   : > { %v2548_v7 = vpop.eup %2547 }
 0x601   : > { %v1346_v11 = vmul.f32 %v2548_v7, %v3041_v33  ;;  %v1459_v10 = vpop.permute.xlu1 %1458 }
 0x602   : > { %v1464_v17 = vsel %vm691_vm3, %v1459_v10, 0 }
 0x603   : > { %v1347_v15 = vpack.c.bf16 %v1346_v11, %v1346_v11 }
 0x605   : > { %v1454_v1 = vpop.xlane.xlu0 %1453 }
 0x606   : > { %2549 = vrcp.f32 %v1454_v1 }
 0x609   : > { %v1239_v3 = vpop.permute.xlu0 %1238 }
 0x60a   : > { %v1244_v4 = vsel %vm691_vm3, %v1239_v3, 0 }
 0x60b   : > { %2353 = vmatpush3.bf16.msra.mxu1 %v1244_v4 }
 0x60c   : > { %2364 = vmatprep.subr.bf16.mxu1 %v2655_v13 }
 0x60e   : > { %2355 = vmatmul.mubr.msk.bf16.vlgmr.msra.gmra.mrb[28].mxu1 %vm629_vm2, %v1237_v32 }
 0x60f   : > { %2365 = vmatpush3.bf16.msra.mxu1 %v1354_v8  ;;  %2366 = vmatprep.mubr.msk.bf16.mxu1 %vm2656_vm1, %v2655_v13 }
 0x610   : > { %2376 = vmatprep.subr.bf16.mxu1 %v2655_v13  ;;  %v2550_v16 = vpop.eup %2549 }
 0x611   : > { %v1456_v18 = vmul.f32 %v2550_v16, %v3045_v36 }
 0x613   : > { %v1457_v19 = vpack.c.bf16 %v1456_v18, %v1456_v18 }
 0x616   : > { %2367 = vmatmul.mubr.msk.bf16.vlgmr.msra.gmra.mrb[32].mxu1 %vm629_vm2, %v1347_v15 }
 0x617   : > { %2377 = vmatpush3.bf16.msra.mxu1 %v1464_v17  ;;  %2378 = vmatprep.mubr.msk.bf16.mxu1 %vm2656_vm1, %v2655_v13 }
 0x61e   : > { %2379 = vmatmul.mubr.msk.bf16.vlgmr.msra.gmra.mrb[36].mxu1 %vm629_vm2, %v1457_v19 }
 0x61f   : > { %1757 = vmatprep.mubr.bf16.mxu1 %v2654_v0 }
 0x6a3   : > { %v840_v20 = vpop.f32.mrb[12].mxu1 }
 0x6a4   : > { %1507 = vrot.lane.b32.xlu1 %v840_v20, %s2672_s25  ;;  %v2308_v21 = vpop.f32.mrb[13].mxu1  ;;  %s2219_s25 = sshll.u32 %s2775_s22, 7  ;;  %s2060_s22 = scalar_lea.sflag [#allocation4], %s2859_s27 }
 0x6a5   : > { %v843_v22 = vpop.f32.mrb[14].mxu1  ;;  %v2489_v21 = vld [vmem:[%s3303_s7 + $0x4] ss:$8 sps:$4 sm:$0xff]   ;;  %s3252_s18 = scalar_lea.hbm %s3342_s15, %s2219_s25 }
 0x6a6   : > { %v2309_v24 = vpop.f32.mrb[15].mxu1  ;;  %v2487_v22 = vld [vmem:[%s3303_s7] ss:$8 sps:$4 sm:$0xff]   ;;  %1725 = vmatprep.subr.bf16.mxu1 %v2489_v21  ;;  %v2517_v21 = vld [vmem:[%s3309_s13 + $0x10] sm:$0xff]  }
 0x6a7   : > { %1726 = vmatpush1.bf16.msra.mxu1 %v2487_v22  ;;  %v2490_v24 = vld [vmem:[%s3303_s7 + $0x10] ss:$8 sps:$4 sm:$0xff]  }
 0x6a8   : > { %v2518_v22 = vld [vmem:[%s3309_s13 + $0x18] sm:$0xff]  }
 0x6ab   : > { %v950_v25 = vpop.f32.mrb[16].mxu1 }
 0x6ac   : > { %1511 = vrot.lane.b32.xlu1 %v950_v25, %s2671_s17  ;;  %v2320_v26 = vpop.f32.mrb[17].mxu1  ;;  %v2495_v25 = vld [vmem:[%s3303_s7 + $0x24] ss:$8 sps:$4 sm:$0xff]   ;;  %s2673_s17 = smov [#allocation5]  }
 0x6ad   : > { %v953_v27 = vpop.f32.mrb[18].mxu1  ;;  %v2493_v26 = vld [vmem:[%s3303_s7 + $0x20] ss:$8 sps:$4 sm:$0xff]  }
 0x6ae   : > { %v2321_v29 = vpop.f32.mrb[19].mxu1  ;;  %v2496_v27 = vld [vmem:[%s3303_s7 + $0x30] ss:$8 sps:$4 sm:$0xff]  }
 0x6af   : > { %v2498_v29 = vld [vmem:[%s3303_s7 + $0x34] ss:$8 sps:$4 sm:$0xff]  }
 0x6b3   : > { %v1060_v30 = vpop.f32.mrb[20].mxu1 }
 0x6b4   : > { %1515 = vrot.lane.b32.xlu0 %v1060_v30, %s2669_s29  ;;  %v2332_v31 = vpop.f32.mrb[21].mxu1  ;;  %s3339_s29 = smov 56   ;;  %v2499_v30 = vld [vmem:[%s3305_s9 + $0x40] sm:$0xff]  }
 0x6b5   : > { %v1063_v33 = vpop.f32.mrb[22].mxu1  ;;  %v2500_v31 = vld [vmem:[%s3305_s9] sm:$0xff]   ;;  %2259 = vmatprep.subr.bf16.mxu0 %v2499_v30 }
 0x6b6   : > { %v2333_v34 = vpop.f32.mrb[23].mxu1  ;;  %v2501_v33 = vld [vmem:[%s3305_s9 + $0x48] sm:$0xff]   ;;  %v2211_v30 = vld [vmem:[%s3308_s12] ss:$0 sm:$0xff] }
 0x6b7   : > { %v2502_v34 = vld [vmem:[%s3305_s9 + $0x8] sm:$0xff]  }
 0x6d1   : > { %v1170_v35 = vpop.f32.mrb[24].mxu1 }
 0x6d2   : > { %1519 = vrot.lane.b32.xlu1 %v1170_v35, %s2667_s26  ;;  %v2344_v0 = vpop.f32.mrb[25].mxu1  ;;  %v2503_v35 = vld [vmem:[%s3305_s9 + $0x50] sm:$0xff]   ;;  %s3341_s26 = sshll.u32 %s2859_s27, 3 }
 0x6d3   : > { %v1173_v36 = vpop.f32.mrb[26].mxu1  ;;  %v2504_v0 = vld [vmem:[%s3305_s9 + $0x10] sm:$0xff]  }
 0x6d4   : > { %v2345_v37 = vpop.f32.mrb[27].mxu1  ;;  %v2505_v36 = vld [vmem:[%s3305_s9 + $0x58] sm:$0xff]  }
 0x6d5   : > { %v2506_v37 = vld [vmem:[%s3305_s9 + $0x18] sm:$0xff]  }
 0x6e1   : > { %v1280_v41 = vpop.f32.mrb[28].mxu1 }
 0x6e2   : > { %1523 = vrot.lane.b32.xlu0 %v1280_v41, %s3337_s28  ;;  %v2356_v42 = vpop.f32.mrb[29].mxu1  ;;  %v2510_v41 = vld [vmem:[%s3305_s9 + $0x28] sm:$0xff]   ;;  %s3340_s28 = sld [smem:[#allocation12_spill]] }
 0x6e3   : > { %v1283_v43 = vpop.f32.mrb[30].mxu1 }
 0x6e4   : > { %v2357_v44 = vpop.f32.mrb[31].mxu1 }
 0x6e8   : > { %p3343_p11 = scmp.ne.s32.totalorder %s3340_s28, 0 }
 0x6e9   : > { %v1390_v46 = vpop.f32.mrb[32].mxu1 }
 0x6ea   : > { %1527 = vrot.lane.b32.xlu1 %v1390_v46, %s3338_s30  ;;  %v2368_v47 = vpop.f32.mrb[33].mxu1  ;;  %v2182_v46 = vld [vmem:[%s3301_s5] ss:$0 sm:$0xff]  ;;  %s509_s30 = scalar_lea.vmem [#allocation5], %s3341_s26  ;;  %s2589_s26 = sshll.u32 %s2673_s17, 4  ;;  %s2590_s26 = int_to_ptr.vmem [resolvable:$false] %s2589_s26 }
 0x6eb   : > { %v1393_v48 = vpop.f32.mrb[34].mxu1  ;;  %s2591_s20 = scalar_lea.vmem %s2590_s26, 256 }
 0x6ec   : > { %v2369_v49 = vpop.f32.mrb[35].mxu1  ;;  %v2183_v48 = vld [vmem:[%s3302_s6] ss:$0 sm:$0xff] }
 0x6f1   : > { %v1500_v28 = vpop.f32.mrb[36].mxu1 }
 0x6f2   : > { %1531 = vrot.lane.b32.xlu0 %v1500_v28, %s3339_s29  ;;  %v2380_v50 = vpop.f32.mrb[37].mxu1  ;;  %s2073_s29 = sshll.u32 %s509_s30, 4  ;;  %s3254_s29 = int_to_ptr.vmem [resolvable:$true] %s2073_s29 }
 0x6f3   : > { %v1503_v51 = vpop.f32.mrb[38].mxu1  ;;  %s2585_s24 = scalar_lea.vmem %s3254_s29, 128  ;;  %p2592_p7 = scmp.lt.s32.totalorder %s3254_s29, %s2590_s26 }
 0x6f4   : > { %v2381_v52 = vpop.f32.mrb[39].mxu1  ;;  %v2511_v51 = vld [vmem:[%s3305_s9 + $0x70] sm:$0xff]   ;;  %p2586_p6 = scmp.ne.s32.totalorder %s3254_s29, %s2585_s24  ;;  %p2593_p10 = scmp.lt.s32.totalorder %s2591_s20, %s2585_s24 }
 0x6f5   : > { %v2512_v52 = vld [vmem:[%s3305_s9 + $0x30] sm:$0xff]  }
 0x6f6   : > { %p2587_p12 = pnand %p2586_p6, %p3343_p11  ;;  %p2594_p2 = por %p2593_p10, %p2592_p7 }
 0x6f8   : > { %p2588_p13 = pneg %p2587_p12 }
 0x6fa   : > { %p2595_p4 = pnand %p2594_p2, %p2588_p13 }
 0x716   : > { %v1508_v53 = vpop.permute.xlu1 %1507 }
 0x717   : > { %v1534_v57 = vsel %vm629_vm2, %v3002_v6, %v1508_v53  ;;  %v2176_v6 = vld [vmem:[%s3300_s4] ss:$0 sm:$0xff]  ;;  %v2513_v53 = vld [vmem:[%s3305_s9 + $0x78] sm:$0xff]  }
 0x71e   : > { %v1512_v54 = vpop.permute.xlu1 %1511 }
 0x71f   : > { %v1536_v58 = vsel %vm1535_vm5, %v1534_v57, %v1512_v54  ;;  %v2514_v54 = vld [vmem:[%s3305_s9 + $0x38] sm:$0xff]  }
 0x726   : > { %v1516_v55 = vpop.permute.xlu0 %1515 }
 0x727   : > { %v1538_v60 = vsel %vm1537_vm6, %v1536_v58, %v1516_v55  ;;  %v1670_v55 = vld [vmem:[%s3304_s8] sm:$0x3] }
 0x728   : > { %v1679_v57 = vrot.slane %v1670_v55, %v529_v23 }
 0x744   : > { %v1520_v56 = vpop.permute.xlu1 %1519 }
 0x745   : > { %v1540_v62 = vsel %vm1539_vm7, %v1538_v60, %v1520_v56  ;;  %v1675_v56 = vrot.slane %v1670_v55, %v525_v14  ;;  %v2193_v14 = vld [vmem:[%s3306_s10] ss:$0 sm:$0xff] }
 0x754   : > { %v1524_v59 = vpop.permute.xlu0 %1523 }
 0x755   : > { %v1542_v63 = vsel %vm1541_vm8, %v1540_v62, %v1524_v59 }
 0x75c   : > { %v1528_v61 = vpop.permute.xlu1 %1527 }
 0x75d   : > { %v1544_v1 = vsel %vm1543_vm9, %v1542_v63, %v1528_v61 }
 0x764   : > { %v1532_v2 = vpop.permute.xlu0 %1531 }
 0x765   : > { %v1546_v3 = vsel %vm1545_vm10, %v1544_v1, %v1532_v2 }
 0x766   : > { %v1547_v4 = vpack.c.bf16 %v1546_v3, %v1546_v3 }
 0x768   : > { %2391 = vmatmul.mubr.msk.bf16.vlgmr.msra.gmra.mrb[28].mxu0 %vm573_vm0, %v1547_v4 }
 0x769   : > { %2260 = vmatpush3.bf16.msra.mxu0 %v2500_v31 }
 0x76a   : > { %2261 = vmatprep.subr.bf16.mxu0 %v2501_v33 }
 0x76d   : > { %2262 = vmatpush3.bf16.msra.mxu0 %v2502_v34  ;;  %v2212_v34 = vld [vmem:[%s3310_s14] ss:$0 sm:$0xff] }
 0x76e   : > { %2263 = vmatprep.subr.bf16.mxu0 %v2503_v35 }
 0x771   : > { %2264 = vmatpush3.bf16.msra.mxu0 %v2504_v0 }
 0x772   : > { %2265 = vmatprep.subr.bf16.mxu0 %v2505_v36 }
 0x775   : > { %2266 = vmatpush3.bf16.msra.mxu0 %v2506_v37 }
 0x776   : > { %2267 = vmatprep.subr.bf16.mxu0 %v2507_v38 }
 0x779   : > { %2268 = vmatpush3.bf16.msra.mxu0 %v2508_v39 }
 0x77a   : > { %2269 = vmatprep.subr.bf16.mxu0 %v2509_v40 }
 0x77d   : > { %2270 = vmatpush3.bf16.msra.mxu0 %v2510_v41 }
 0x77e   : > { %2271 = vmatprep.subr.bf16.mxu0 %v2511_v51 }
 0x781   : > { %2272 = vmatpush3.bf16.msra.mxu0 %v2512_v52 }
 0x782   : > { %2273 = vmatprep.subr.bf16.mxu0 %v2513_v53 }
 0x785   : > { %2274 = vmatpush3.bf16.msra.mxu0 %v2514_v54 }
 0x83b   : > { %v1624_v5 = vpop.f32.mrb[28].mxu0 }
 0x83c   : > { %v1625_v32 = vadd.f32 %v2176_v6, %v1624_v5  ;;  %v2392_v7 = vpop.f32.mrb[29].mxu0 }
 0x83d   : > { %v1627_v8 = vpop.f32.mrb[30].mxu0 }
 0x83e   : > { %v2393_v11 = vpop.f32.mrb[31].mxu0  ;;  %v1630_v10 = vadd.f32 %v1625_v32, %v2894_v9  ;;  %v2492_v9 = vld [vmem:[%s3303_s7 + $0x14] ss:$8 sps:$4 sm:$0xff]  }
 0x83f   : > { %1727 = vmatprep.subr.bf16.mxu1 %v2492_v9 }
 0x840   : > { %v1633_v15 = vsel %vm573_vm0, %v1630_v10, 0.0  ;;  %1728 = vmatpush1.bf16.msra.mxu1 %v2490_v24 }
 0x841   : > { %1634 = vadd.xlane.f32.xlu1 %v1633_v15  ;;  %1729 = vmatprep.subr.bf16.mxu1 %v2495_v25 }
 0x844   : > { %1730 = vmatpush1.bf16.msra.mxu1 %v2493_v26 }
 0x845   : > { %1731 = vmatprep.subr.bf16.mxu1 %v2498_v29 }
 0x848   : > { %1732 = vmatpush1.bf16.msra.mxu1 %v2496_v27  ;;  %v2210_v27 = vld [vmem:[%s3307_s11] ss:$0 sm:$0xff] }
 0x849   : > { %2394 = vmatprep.subr.bf16.mxu1 %v2655_v13 }
 0x8ce   : > { %v1635_v16 = vpop.xlane.xlu1 %1634 }
 0x8cf   : > { %v1637_v17 = vmul.f32 0.015625, %v1635_v16 }
 0x8d1   : > { %v1638_v18 = vsub.f32 %v1630_v10, %v1637_v17 }
 0x8d3   : > { %v1639_v19 = vmul.f32 %v1638_v18, %v1638_v18 }
 0x8d5   : > { %v1640_v20 = vsel %vm573_vm0, %v1639_v19, 0.0  ;;  %v2515_v19 = vld [vmem:[%s3309_s13] sm:$0xff]  }
 0x8d6   : > { %1641 = vadd.xlane.f32.xlu0 %v1640_v20  ;;  %v2516_v20 = vld [vmem:[%s3309_s13 + $0x8] sm:$0xff]  }
 0x963   : > { %v1642_v42 = vpop.xlane.xlu0 %1641 }
 0x964   : > { %v1643_v43 = vmul.f32 0.015625, %v1642_v42 }
 0x966   : > { %v1644_v44 = vadd.f32 1e-05, %v1643_v43 }
 0x968   : > { %2551 = vrsqrt.f32 %v1644_v44 }
 0x972   : > { %v2552_v45 = vpop.eup %2551 }
 0x973   : > { %v1646_v47 = vmul.f32 %v2552_v45, %v1638_v18 }
 0x975   : > { %v1653_v49 = vmul.f32 %v2182_v46, %v1646_v47 }
 0x977   : > { %v1660_v28 = vadd.f32 %v2183_v48, %v1653_v49 }
 0x979   : > { %v1661_v50 = vpack.c.bf16 %v1660_v28, %v1660_v28 }
 0x97b   : > { %2192 = vmatmul.mubr.msk.bf16.vlgmr.msra.gmra.mrb[40].mxu1 %vm573_vm0, %v1661_v50 }
 0x97c   : > { %2402 = vmatprep.mubr.msk.bf16.mxu1 %vm2656_vm1, %v2655_v13  ;;  %2395 = vmatpush3.bf16.msra.mxu1 %v2515_v19 }
 0x97d   : > { %2396 = vmatprep.subr.bf16.mxu1 %v2655_v13 }
 0x980   : > { %2397 = vmatpush3.bf16.msra.mxu1 %v2516_v20 }
 0x981   : > { %2398 = vmatprep.subr.bf16.mxu1 %v2655_v13 }
 0x984   : > { %2399 = vmatpush3.bf16.msra.mxu1 %v2517_v21 }
 0x985   : > { %2400 = vmatprep.subr.bf16.mxu1 %v2655_v13 }
 0x988   : > { %2401 = vmatpush3.bf16.msra.mxu1 %v2518_v22 }
 0xa4e   : > { %v1759_v58 = vpop.f32.mrb[40].mxu1 }
 0xa4f   : > { %v1760_v59 = vadd.f32 %v1759_v58, %v1675_v56  ;;  %v1761_v60 = vpop.f32.mrb[41].mxu1 }
 0xa50   : > { %v1762_v61 = vadd.f32 %v1761_v60, %v1679_v57  ;;  %v1763_v62 = vpop.f32.mrb[42].mxu1 }
 0xa51   : > { %v1766_v63 = vmax.f32 %v1760_v59, 0.0  ;;  %v1764_v1 = vpop.f32.mrb[43].mxu1 }
 0xa52   : > { %v1767_v2 = vmax.f32 %v1762_v61, 0.0 }
 0xa53   : > { %v1768_v4 = vpack.c.bf16 %v1766_v63, %v1766_v63 }
 0xa54   : > { %v1769_v3 = vpack.c.bf16 %v1767_v2, %v1767_v2 }
 0xa56   : > { %1937 = vmatprep.mubr.bf16.mxu0 %v1769_v3 }
 0xa57   : > { %1938 = vmatmul.mubr.bf16.vlgmr.msra.gmra.mrb[32].mxu0 %v1768_v4 }
 0xb2a   : > { %v2275_v6 = vpop.f32.mrb[32].mxu0 }
 0xb2b   : > { %v2276_v5 = vpop.f32.mrb[33].mxu0 }
 0xb2c   : > { %v2277_v12 = vadd.f32 %v2276_v5, %v2275_v6  ;;  %v2278_v23 = vpop.f32.mrb[34].mxu0 }
 0xb2d   : > { %v2279_v32 = vpop.f32.mrb[35].mxu0 }
 0xb2e   : > { %v1940_v7 = vadd.f32 %v2277_v12, %v2193_v14 }
 0xb30   : > { %v1945_v8 = vadd.f32 %v1940_v7, %v1660_v28 }
 0xb32   : > { %v1948_v11 = vsel %vm573_vm0, %v1945_v8, 0.0 }
 0xb33   : > { %1949 = vadd.xlane.f32.xlu0 %v1948_v11 }
 0xbc0   : > { %v1950_v10 = vpop.xlane.xlu0 %1949 }
 0xbc1   : > { %v1951_v15 = vmul.f32 0.015625, %v1950_v10 }
 0xbc3   : > { %v1952_v16 = vsub.f32 %v1945_v8, %v1951_v15 }
 0xbc5   : > { %v1953_v17 = vmul.f32 %v1952_v16, %v1952_v16 }
 0xbc7   : > { %v1954_v18 = vsel %vm573_vm0, %v1953_v17, 0.0 }
 0xbc8   : > { %1955 = vadd.xlane.f32.xlu1 %v1954_v18 }
 0xc55   : > { %v1956_v9 = vpop.xlane.xlu1 %1955 }
 0xc56   : > { %v1957_v24 = vmul.f32 0.015625, %v1956_v9 }
 0xc58   : > { %v1958_v25 = vadd.f32 1e-05, %v1957_v24 }
 0xc5a   : > { %2553 = vrsqrt.f32 %v1958_v25 }
 0xc64   : > { %v2554_v26 = vpop.eup %2553 }
 0xc65   : > { %v1960_v29 = vmul.f32 %v2554_v26, %v1952_v16 }
 0xc67   : > { %v1967_v31 = vmul.f32 %v2210_v27, %v1960_v29 }
 0xc69   : > { %v1974_v33 = vadd.f32 %v2211_v30, %v1967_v31 }
 0xc6b   : > { %v1975_v13 = vpack.c.bf16 %v1974_v33, %v1974_v33 }
 0xc6d   : > { %2403 = vmatmul.mubr.msk.bf16.vlgmr.msra.gmra.mrb[44].mxu1 %vm573_vm0, %v1975_v13 }
 0xd40   : > { %v2052_v35 = vpop.f32.mrb[44].mxu1 }
 0xd41   : > { %v2053_v0 = vadd.f32 %v2212_v34, %v2052_v35  ;;  %v2404_v36 = vpop.f32.mrb[45].mxu1 }
 0xd42   : > { %v2055_v37 = vpop.f32.mrb[46].mxu1 }
 0xd43   : > { %2058 = vst [vmem:[%s509_s30] sm:$0xff] %v2053_v0  ;;  %v2405_v38 = vpop.f32.mrb[47].mxu1 }
 0xd44   : > { %2598 = shalt.err (!%p2595_p4)
}
 0xd45   : > { %s2599_s27 = scalar_lea.hbm %s3252_s18, 128  ;;  %s2603_s23 = scalar_lea.hbm %s3342_s15, 256 }
 0xd46   : > { %p2600_p5 = scmp.ne.s32.totalorder %s3252_s18, %s2599_s27  ;;  %p2604_p0 = scmp.lt.u32.totalorder %s3252_s18, %s3342_s15 }
 0xd47   : > { %p2605_p1 = scmp.lt.u32.totalorder %s2603_s23, %s2599_s27  ;;  %p2607_p6 = scmp.lt.u32.totalorder %s2599_s27, %s3252_s18 }
 0xd48   : > { %p2601_p8 = pnand %p2600_p5, %p3343_p11 }
 0xd49   : > { %p2606_p3 = por %p2605_p1, %p2604_p0 }
 0xd4a   : > { %p2602_p9 = pneg %p2601_p8 }
 0xd4b   : > { %p2608_p12 = por %p2607_p6, %p2606_p3 }
 0xd4d   : > { %p2609_p13 = pnand %p2608_p12, %p2602_p9 }
 0xd4f   : > { %2612 = shalt.err (!%p2609_p13)
}
 0xd50   : > { %2408 = dma.vmem_to_hbm [thread:$0]  (%p3343_p11), %s3254_s29, 128, %s3252_s18, %s2060_s22  }
 0xd51 PF: > { %s3344_s24 = sld [smem:[#allocation8_spill]]  ;;  %p3345_p7 = scmp.ne.s32.totalorder %s3333_s16, 0 }
 0xd52   : > { %p3346_p10 = scmp.ge.s32.totalorder %s2651_s21, 2 }
 0xd54   : > { %p2415_p2 = pnand %p3346_p10, %p3345_p7 }
 0xd57   : > { %s2085_s20 = sand.u32 1, %s3344_s24  }
 0xd58   : > { %s2086_s25 = scalar_lea.sflag [#allocation4], %s2085_s20 }
 0xd59   : > { %2634 = dma.done.wait (!%p2415_p2), %s2086_s25, 128  }
 0xd5a   : > { %2636 = vsyncadd (!%p2415_p2), %s2086_s25, 4294967168  ;;  %s3347_s21 = sld [smem:[#allocation10_spill]]  ;;  %s3348_s27 = sld [smem:[#allocation9_spill]] }
 0xd5b   : > { %s3349_s20 = sld [smem:[#allocation11_spill]]  ;;  %s3350_s18 = smov %s2643_s19 }
 0xd60   : > { %p28_p4 = scmp.ge.s32.totalorder %s3347_s21, 4   ;;  %s3351_s19 = smov %s3348_s27 }
 0xd62   :  { %30 = sbr.rel (!%p28_p4) target bundleno = 7 (0x7), region = 125 }
 0xd69   :  { %2091 = vsyncpa [#allocation3], 1 }
 0xd6a   :  { %2093 = vsyncpa [#allocation3 + $0x1], 1 }
 0xd6b   :  { %2094 = vsyncpa [#allocation4], 1 }
 0xd6c   :  { %2096 = vsyncpa [#allocation4 + $0x1], 1 }

</bundles_post_ra>
